<compile_context>
chip_gen: v5e
topology: v5e:2x2
jax: 0.10.0
libtpu: 0.0.40
codegen_flags: <defaults>
</compile_context>

<pallas_src>
import functools

import jax
import jax.numpy as jnp
from jax import lax
from jax.experimental import pallas as pl
from jax.experimental.pallas import tpu as pltpu

_BN_EPS = 1e-5
_LANES = 128  # TPU lane width; channel dims are padded to a multiple of this.


def _round_up(x, m):
    return (x + m - 1) // m * m


def _pad_to(a, shape):
    pads = [(0, t - s) for s, t in zip(a.shape, shape)]
    if all(p == (0, 0) for p in pads):
        return a
    return jnp.pad(a, pads)


def _fold_bn(bn):
    scale = bn["gamma"] / jnp.sqrt(bn["var"] + _BN_EPS)
    bias = bn["beta"] - bn["mean"] * scale
    return scale, bias


def _pow2_divisor(x, cap=256):
    d = 1
    while x % (d * 2) == 0 and d < cap:
        d *= 2
    return d


def _hint(x, m):
    """Alignment hint for dynamic slice starts."""
    return pl.multiple_of(x, m) if m > 1 else x


def _pick_band_rows(h, w, target=2048):
    """Largest row-band (divisor of H) whose flattened band is <= target rows."""
    if h * w <= target:
        return h
    cands = [d for d in range(1, h)
             if h % d == 0 and d * w <= target and (d * w) % 8 == 0]
    return max(cands) if cands else h


# ------------------------------ Pallas kernel ------------------------------ #

def _bottleneck_kernel(x_ref, w1_ref, w2_ref, w3_ref,
                       s1_ref, b1_ref, s2_ref, b2_ref, s3_ref, b3_ref,
                       o_ref, t1_ref, patch_ref, *, w, band, cdt):
    """One (batch, row-band) grid step.

    x_ref    : (H*W, Cp)            whole image, original dtype (residual source)
    w1_ref   : (Cp, Pp)             1x1 reduce weights   (compute dtype)
    w2_ref   : (3, 3*Pp, Pp)        3x3 weights, kx folded along K (compute dtype)
    w3_ref   : (Pp, Cp)             1x1 expand weights   (compute dtype)
    s*/b*    : (1, Pp|Cp)           folded BatchNorm scale / bias (f32)
    o_ref    : (band*W, Cp)         output row band (original dtype)
    t1_ref   : ((band+2)*W, Pp)     f32 stage-1 band + 1-row H halo
    patch_ref: ((band+2)*W, 3*Pp)   W-shifted taps concatenated along K (compute dtype)
    """
    r = pl.program_id(1)
    nb = pl.num_programs(1)
    pp = w1_ref.shape[1]
    bw = band * w
    hw_halo = (band + 2) * w
    row0 = r * band                      # first output row of this band

    def stage1(xs):                      # 1x1 conv + BN1 + ReLU (f32 epilogue)
        t = jnp.dot(xs.astype(cdt), w1_ref[...],
                    preferred_element_type=jnp.float32)
        return jnp.maximum(t * s1_ref[...] + b1_ref[...], 0.0)

    # ---- stage 1 into the H-halo scratch (no bulk re-zero) ----------------
    start_i = _hint(row0 * w, _pow2_divisor(bw))
    x_band = x_ref[pl.ds(start_i, bw), :]            # original dtype (residual)
    t1_ref[w:w + bw, :] = stage1(x_band)

    @pl.when(r > 0)                                  # top halo row: recompute
    def _():
        st = _hint((row0 - 1) * w, _pow2_divisor(w))
        t1_ref[0:w, :] = stage1(x_ref[pl.ds(st, w), :])

    @pl.when(r == 0)                                 # image edge: zero pad
    def _():
        t1_ref[0:w, :] = jnp.zeros((w, pp), jnp.float32)

    @pl.when(r < nb - 1)                             # bottom halo row: recompute
    def _():
        st = _hint((row0 + band) * w, _pow2_divisor(w))
        t1_ref[(band + 1) * w:, :] = stage1(x_ref[pl.ds(st, w), :])

    @pl.when(r == nb - 1)                            # image edge: zero pad
    def _():
        t1_ref[(band + 1) * w:, :] = jnp.zeros((w, pp), jnp.float32)

    # ---- stage 2: 3x3 conv.  W shifts via XLU roll + edge mask ------------
    t_all = t1_ref[...]                              # ((band+2)*W, Pp) f32
    col = lax.broadcasted_iota(jnp.int32, (hw_halo, 1), 0) % w
    zeros = jnp.zeros_like(t_all)
    left = pltpu.roll(t_all, 1, axis=0)              # value at x-1 (wrap masked)
    right = pltpu.roll(t_all, hw_halo - 1, axis=0)   # value at x+1 (== shift -1)
    # Single cast to compute dtype while storing the K-folded patch buffer.
    patch_ref[:, 0:pp] = jnp.where(col == 0, zeros, left).astype(cdt)
    patch_ref[:, pp:2 * pp] = t_all.astype(cdt)
    patch_ref[:, 2 * pp:3 * pp] = jnp.where(col == w - 1, zeros, right).astype(cdt)

    # One K = 3*Pp matmul per ky; only two f32 adds instead of nine.
    acc = None
    for ky in range(3):
        blk = patch_ref[ky * w:ky * w + bw, :]       # sublane-aligned if W%8==0
        c = jnp.dot(blk, w2_ref[ky], preferred_element_type=jnp.float32)
        acc = c if acc is None else acc + c

    t2 = jnp.maximum(acc * s2_ref[...] + b2_ref[...], 0.0).astype(cdt)

    # ---- stage 3: 1x1 conv + BN + identity residual (f32) + ReLU ----------
    y = jnp.dot(t2, w3_ref[...], preferred_element_type=jnp.float32)
    y = y * s3_ref[...] + b3_ref[...] + x_band.astype(jnp.float32)
    o_ref[...] = jnp.maximum(y, 0.0).astype(o_ref.dtype)


# --------------------------------- wrapper --------------------------------- #

@functools.partial(jax.jit, static_argnames=("compute_dtype", "band_rows"))
def bottleneck_forward(x_nhwc, params, compute_dtype=jnp.bfloat16,
                       band_rows=None):
    """Bottleneck forward. x_nhwc: (N, H, W, inplanes)."""
    n, h, w, cin = x_nhwc.shape
    planes = params["w1"].shape[1]
    cout = params["w3"].shape[1]
    assert cin == cout, (
        "identity residual requires inplanes == expansion*planes, got "
        f"inplanes={cin}, expansion*planes={cout}")
    # TODO(synk): project / stride>1 path not implemented (module default).

    cp = _round_up(cin, _LANES)      # padded in/out channels (lane-dense)
    pp = _round_up(planes, _LANES)   # padded bottleneck channels
    hw = h * w

    band = band_rows if band_rows is not None else _pick_band_rows(h, w)
    assert h % band == 0, f"band_rows={band} must divide H={h}"
    assert band == h or (band * w) % 8 == 0, "band*W must be a multiple of 8"
    nb = h // band
    bw = band * w

    s1, b1 = _fold_bn(params["bn1"])
    s2, b2 = _fold_bn(params["bn2"])
    s3, b3 = _fold_bn(params["bn3"])

    w1 = _pad_to(params["w1"], (cp, pp)).astype(compute_dtype)
    w2 = (_pad_to(params["w2"], (3, 3, pp, pp)).astype(compute_dtype)
          .reshape(3, 3 * pp, pp))                   # fold kx into K
    w3 = _pad_to(params["w3"], (pp, cp)).astype(compute_dtype)
    s1 = _pad_to(s1, (pp,)).reshape(1, pp)
    b1 = _pad_to(b1, (pp,)).reshape(1, pp)
    s2 = _pad_to(s2, (pp,)).reshape(1, pp)
    b2 = _pad_to(b2, (pp,)).reshape(1, pp)
    s3 = _pad_to(s3, (cp,)).reshape(1, cp)
    b3 = _pad_to(b3, (cp,)).reshape(1, cp)

    # x stays in its original dtype so the residual add is full precision.
    xr = _pad_to(x_nhwc, (n, h, w, cp)).reshape(n, hw, cp)

    cdt_size = jnp.dtype(compute_dtype).itemsize
    x_size = jnp.dtype(x_nhwc.dtype).itemsize

    flops = 2 * n * hw * (cp * pp + 9 * pp * pp + pp * cp)
    bytes_accessed = int(2 * n * hw * cp * x_size                    # x in + out
                         + (w1.size + w2.size + w3.size) * cdt_size  # weights
                         + 2 * (2 * pp + cp) * 4)                    # BN scale/bias

    # Explicit scoped-VMEM budget (blocks are double-buffered by the pipeliner).
    block_bytes = (2 * hw * cp * x_size                      # x block
                   + 2 * bw * cp * x_size                    # output band
                   + 2 * (w1.size + w2.size + w3.size) * cdt_size
                   + 2 * 6 * max(pp, cp) * 4)                # scale/bias
    scratch_bytes = (band + 2) * w * pp * (4 + 3 * cdt_size)  # t1 + patch
    temp_bytes = 8 * bw * max(pp, cp) * 4                     # f32 temporaries
    vmem_limit = int(min(max(1.5 * (block_bytes + scratch_bytes + temp_bytes),
                             16 * 1024 * 1024), 64 * 1024 * 1024))

    kernel = functools.partial(_bottleneck_kernel, w=w, band=band,
                               cdt=compute_dtype)

    out = pl.pallas_call(
        kernel,
        out_shape=jax.ShapeDtypeStruct((n, hw, cp), x_nhwc.dtype),
        grid=(n, nb),
        in_specs=[
            pl.BlockSpec((None, hw, cp), lambda b, r: (b, 0, 0)),     # x (whole image)
            pl.BlockSpec((cp, pp), lambda b, r: (0, 0)),              # w1
            pl.BlockSpec((3, 3 * pp, pp), lambda b, r: (0, 0, 0)),    # w2 (K-folded)
            pl.BlockSpec((pp, cp), lambda b, r: (0, 0)),              # w3
            pl.BlockSpec((1, pp), lambda b, r: (0, 0)),               # s1
            pl.BlockSpec((1, pp), lambda b, r: (0, 0)),               # b1
            pl.BlockSpec((1, pp), lambda b, r: (0, 0)),               # s2
            pl.BlockSpec((1, pp), lambda b, r: (0, 0)),               # b2
            pl.BlockSpec((1, cp), lambda b, r: (0, 0)),               # s3
            pl.BlockSpec((1, cp), lambda b, r: (0, 0)),               # b3
        ],
        out_specs=pl.BlockSpec((None, bw, cp), lambda b, r: (b, r, 0)),
        scratch_shapes=[
            pltpu.VMEM(((band + 2) * w, pp), jnp.float32),       # stage-1 + H halo
            pltpu.VMEM(((band + 2) * w, 3 * pp), compute_dtype),  # shifted taps
        ],
        compiler_params=pltpu.CompilerParams(
            dimension_semantics=("parallel", "parallel"),
            vmem_limit_bytes=vmem_limit),
        cost_estimate=pl.CostEstimate(flops=flops, transcendentals=0,
                                      bytes_accessed=bytes_accessed),
    )(xr, w1, w2, w3, s1, b1, s2, b2, s3, b3)

    return out.reshape(n, h, w, cp)[..., :cout]


# --------------------------- pure-JAX reference ---------------------------- #

def _ref_forward(x_nhwc, params):
    dn = ("NHWC", "HWIO", "NHWC")

    def bn(y, p):
        scale = p["gamma"] / jnp.sqrt(p["var"] + _BN_EPS)
        return y * scale + (p["beta"] - p["mean"] * scale)

    w1 = params["w1"][None, None]          # (1,1,Cin,Cout)
    w3 = params["w3"][None, None]
    out = jax.lax.conv_general_dilated(x_nhwc, w1, (1, 1), "VALID",
                                       dimension_numbers=dn)
    out = jax.nn.relu(bn(out, params["bn1"]))
    out = jax.lax.conv_general_dilated(out, params["w2"], (1, 1), "SAME",
                                       dimension_numbers=dn)
    out = jax.nn.relu(bn(out, params["bn2"]))
    out = jax.lax.conv_general_dilated(out, w3, (1, 1), "VALID",
                                       dimension_numbers=dn)
    out = bn(out, params["bn3"])
    return jax.nn.relu(out + x_nhwc)


# --------------------------------- main ------------------------------------ #

def _make_params(key, inplanes, planes):
    expansion = 4
    ks = jax.random.split(key, 12)

    def bn_params(k, c):
        k1, k2, k3 = jax.random.split(k, 3)
        return {
            "gamma": 1.0 + 0.1 * jax.random.normal(k1, (c,), jnp.float32),
            "beta": 0.1 * jax.random.normal(k2, (c,), jnp.float32),
            "mean": 0.1 * jax.random.normal(k3, (c,), jnp.float32),
            "var": jnp.abs(jax.random.normal(jax.random.fold_in(k, 7),
                                             (c,), jnp.float32)) + 0.5,
        }

    return {
        "w1": 0.1 * jax.random.normal(ks[0], (inplanes, planes), jnp.float32),
        "bn1": bn_params(ks[1], planes),
        "w2": 0.1 * jax.random.normal(ks[2], (3, 3, planes, planes),
                                      jnp.float32),
        "bn2": bn_params(ks[3], planes),
        "w3": 0.1 * jax.random.normal(ks[4], (planes, expansion * planes),
                                      jnp.float32),
        "bn3": bn_params(ks[5], expansion * planes),
    }


if __name__ == "__main__":
    key = jax.random.PRNGKey(0)
    n, h, w = 2, 16, 16
    planes = 4
    inplanes = 4 * planes  # 16; identity residual requires inplanes == 4*planes

    kx, kp = jax.random.split(key)
    # PyTorch-convention input is NCHW; transpose to the kernel's NHWC layout.
    x_nchw = jax.random.normal(kx, (n, inplanes, h, w), jnp.float32)
    x_nhwc = jnp.transpose(x_nchw, (0, 2, 3, 1))

    params = _make_params(kp, inplanes, planes)
    ref = _ref_forward(x_nhwc, params)

    # f32 path, 4 row-bands (exercises halo recompute + both image edges).
    out_f32 = jax.block_until_ready(
        bottleneck_forward(x_nhwc, params, compute_dtype=jnp.float32,
                           band_rows=4))
    assert out_f32.shape == (n, h, w, 4 * planes), out_f32.shape
    err_f32 = float(jnp.max(jnp.abs(out_f32 - ref)))
    assert err_f32 < 1e-3, f"f32 multi-band max abs error {err_f32}"

    # f32 path, default band heuristic (single band here).
    out_f32b = jax.block_until_ready(
        bottleneck_forward(x_nhwc, params, compute_dtype=jnp.float32))
    err_f32b = float(jnp.max(jnp.abs(out_f32b - ref)))
    assert err_f32b < 1e-3, f"f32 single-band max abs error {err_f32b}"

    # bf16 MXU path (all generations); accumulation, BN epilogues and the
    # residual add stay f32, so only matmul operands lose precision.
    out_bf16 = jax.block_until_ready(
        bottleneck_forward(x_nhwc, params, compute_dtype=jnp.bfloat16,
                           band_rows=8))
    err_bf16 = float(jnp.max(jnp.abs(out_bf16 - ref)))
    assert err_bf16 < 1e-1, f"bf16 max abs error {err_bf16}"

    print("KERNEL_OK")
</pallas_src>

<mosaic_0001>
module attributes {stable_mosaic.version = 11 : i64} {
  func.func @_bottleneck_kernel(%arg0: i32, %arg1: i32, %arg2: memref<1x256x128xf32, #tpu.memory_space<vmem>>, %arg3: memref<128x128xf32, #tpu.memory_space<vmem>>, %arg4: memref<3x384x128xf32, #tpu.memory_space<vmem>>, %arg5: memref<128x128xf32, #tpu.memory_space<vmem>>, %arg6: memref<1x128xf32, #tpu.memory_space<vmem>>, %arg7: memref<1x128xf32, #tpu.memory_space<vmem>>, %arg8: memref<1x128xf32, #tpu.memory_space<vmem>>, %arg9: memref<1x128xf32, #tpu.memory_space<vmem>>, %arg10: memref<1x128xf32, #tpu.memory_space<vmem>>, %arg11: memref<1x128xf32, #tpu.memory_space<vmem>>, %arg12: memref<1x64x128xf32, #tpu.memory_space<vmem>>, %arg13: memref<96x128xf32, #tpu.memory_space<vmem>>, %arg14: memref<96x384xf32, #tpu.memory_space<vmem>>) attributes {dimension_semantics = [#tpu.dimension_semantics<parallel>, #tpu.dimension_semantics<parallel>], iteration_bounds = array<i64: 2, 4>, scalar_prefetch = 0 : i64, scratch_operands = 2 : i64, tpu.core_type = #tpu.core_type<tc>, window_params = [{transform_indices = @transform_0, window_bounds = array<i64: 1, 256, 128>}, {pipeline_mode = #tpu.pipeline_mode<synchronous>, transform_indices = @transform_1, window_bounds = array<i64: 128, 128>}, {pipeline_mode = #tpu.pipeline_mode<synchronous>, transform_indices = @transform_2, window_bounds = array<i64: 3, 384, 128>}, {pipeline_mode = #tpu.pipeline_mode<synchronous>, transform_indices = @transform_3, window_bounds = array<i64: 128, 128>}, {pipeline_mode = #tpu.pipeline_mode<synchronous>, transform_indices = @transform_4, window_bounds = array<i64: 1, 128>}, {pipeline_mode = #tpu.pipeline_mode<synchronous>, transform_indices = @transform_5, window_bounds = array<i64: 1, 128>}, {pipeline_mode = #tpu.pipeline_mode<synchronous>, transform_indices = @transform_6, window_bounds = array<i64: 1, 128>}, {pipeline_mode = #tpu.pipeline_mode<synchronous>, transform_indices = @transform_7, window_bounds = array<i64: 1, 128>}, {pipeline_mode = #tpu.pipeline_mode<synchronous>, transform_indices = @transform_8, window_bounds = array<i64: 1, 128>}, {pipeline_mode = #tpu.pipeline_mode<synchronous>, transform_indices = @transform_9, window_bounds = array<i64: 1, 128>}, {transform_indices = @transform_10, window_bounds = array<i64: 1, 64, 128>}]} {
    %c4_i32 = arith.constant 4 : i32
    %0 = arith.muli %arg1, %c4_i32 : i32
    %c16_i32 = arith.constant 16 : i32
    %1 = arith.muli %0, %c16_i32 : i32
    %2 = tpu.assume_multiple %1, 64 : i32
    %c0 = arith.constant 0 : index
    %3 = arith.index_cast %2 : i32 to index
    %c0_0 = arith.constant 0 : index
    %4 = vector.load %arg2[%c0, %3, %c0_0] : memref<1x256x128xf32, #tpu.memory_space<vmem>>, vector<1x64x128xf32>
    %5 = vector.shape_cast %4 : vector<1x64x128xf32> to vector<64x128xf32>
    %c0_1 = arith.constant 0 : index
    %c0_2 = arith.constant 0 : index
    %6 = vector.load %arg3[%c0_1, %c0_2] : memref<128x128xf32, #tpu.memory_space<vmem>>, vector<128x128xf32>
    %cst = arith.constant dense<0.000000e+00> : vector<64x128xf32>
    %7 = tpu.matmul %5, %6, %cst {dimension_numbers = #tpu.dot_dimension_numbers<[1], [0], [0], [1], [0, 0, 1, 1], [], []>} : vector<64x128xf32>, vector<128x128xf32>, vector<64x128xf32> -> vector<64x128xf32>
    %c0_3 = arith.constant 0 : index
    %c0_4 = arith.constant 0 : index
    %8 = vector.load %arg6[%c0_3, %c0_4] : memref<1x128xf32, #tpu.memory_space<vmem>>, vector<1x128xf32>
    %9 = vector.broadcast %8 : vector<1x128xf32> to vector<64x128xf32>
    %10 = arith.mulf %7, %9 : vector<64x128xf32>
    %c0_5 = arith.constant 0 : index
    %c0_6 = arith.constant 0 : index
    %11 = vector.load %arg7[%c0_5, %c0_6] : memref<1x128xf32, #tpu.memory_space<vmem>>, vector<1x128xf32>
    %12 = vector.broadcast %11 : vector<1x128xf32> to vector<64x128xf32>
    %13 = arith.addf %10, %12 : vector<64x128xf32>
    %cst_7 = arith.constant 0.000000e+00 : f32
    %14 = vector.broadcast %cst_7 : f32 to vector<64x128xf32>
    %15 = arith.maximumf %13, %14 : vector<64x128xf32>
    %c16 = arith.constant 16 : index
    %c0_8 = arith.constant 0 : index
    %16 = vector.load %arg13[%c16, %c0_8] : memref<96x128xf32, #tpu.memory_space<vmem>>, vector<64x128xf32>
    tpu.vector_store %arg13[%c16, %c0_8], %15 {strides = array<i32>} : memref<96x128xf32, #tpu.memory_space<vmem>>, vector<64x128xf32>,
    %c0_i32 = arith.constant 0 : i32
    %17 = arith.cmpi sgt, %arg1, %c0_i32 : i32
    %18 = arith.extui %17 : i1 to i32
    %c0_i32_9 = arith.constant 0 : i32
    %19 = arith.cmpi ne, %18, %c0_i32_9 : i32
    scf.if %19 {
      %c1_i32_60 = arith.constant 1 : i32
      %99 = arith.subi %0, %c1_i32_60 : i32
      %c16_i32_61 = arith.constant 16 : i32
      %100 = arith.muli %99, %c16_i32_61 : i32
      %101 = tpu.assume_multiple %100, 16 : i32
      %c0_62 = arith.constant 0 : index
      %102 = arith.index_cast %101 : i32 to index
      %c0_63 = arith.constant 0 : index
      %103 = vector.load %arg2[%c0_62, %102, %c0_63] : memref<1x256x128xf32, #tpu.memory_space<vmem>>, vector<1x16x128xf32>
      %104 = vector.shape_cast %103 : vector<1x16x128xf32> to vector<16x128xf32>
      %c0_64 = arith.constant 0 : index
      %c0_65 = arith.constant 0 : index
      %105 = vector.load %arg3[%c0_64, %c0_65] : memref<128x128xf32, #tpu.memory_space<vmem>>, vector<128x128xf32>
      %cst_66 = arith.constant dense<0.000000e+00> : vector<16x128xf32>
      %106 = tpu.matmul %104, %105, %cst_66 {dimension_numbers = #tpu.dot_dimension_numbers<[1], [0], [0], [1], [0, 0, 1, 1], [], []>} : vector<16x128xf32>, vector<128x128xf32>, vector<16x128xf32> -> vector<16x128xf32>
      %c0_67 = arith.constant 0 : index
      %c0_68 = arith.constant 0 : index
      %107 = vector.load %arg6[%c0_67, %c0_68] : memref<1x128xf32, #tpu.memory_space<vmem>>, vector<1x128xf32>
      %108 = vector.broadcast %107 : vector<1x128xf32> to vector<16x128xf32>
      %109 = arith.mulf %106, %108 : vector<16x128xf32>
      %c0_69 = arith.constant 0 : index
      %c0_70 = arith.constant 0 : index
      %110 = vector.load %arg7[%c0_69, %c0_70] : memref<1x128xf32, #tpu.memory_space<vmem>>, vector<1x128xf32>
      %111 = vector.broadcast %110 : vector<1x128xf32> to vector<16x128xf32>
      %112 = arith.addf %109, %111 : vector<16x128xf32>
      %cst_71 = arith.constant 0.000000e+00 : f32
      %113 = vector.broadcast %cst_71 : f32 to vector<16x128xf32>
      %114 = arith.maximumf %112, %113 : vector<16x128xf32>
      %c0_72 = arith.constant 0 : index
      %c0_73 = arith.constant 0 : index
      %115 = vector.load %arg13[%c0_72, %c0_73] : memref<96x128xf32, #tpu.memory_space<vmem>>, vector<16x128xf32>
      tpu.vector_store %arg13[%c0_72, %c0_73], %114 {strides = array<i32>} : memref<96x128xf32, #tpu.memory_space<vmem>>, vector<16x128xf32>,
    } else {
    }
    %c0_i32_10 = arith.constant 0 : i32
    %20 = arith.cmpi eq, %arg1, %c0_i32_10 : i32
    %21 = arith.extui %20 : i1 to i32
    %c0_i32_11 = arith.constant 0 : i32
    %22 = arith.cmpi ne, %21, %c0_i32_11 : i32
    scf.if %22 {
      %cst_60 = arith.constant 0.000000e+00 : f32
      %99 = vector.broadcast %cst_60 : f32 to vector<16x128xf32>
      %c0_61 = arith.constant 0 : index
      %c0_62 = arith.constant 0 : index
      %100 = vector.load %arg13[%c0_61, %c0_62] : memref<96x128xf32, #tpu.memory_space<vmem>>, vector<16x128xf32>
      tpu.vector_store %arg13[%c0_61, %c0_62], %99 {strides = array<i32>} : memref<96x128xf32, #tpu.memory_space<vmem>>, vector<16x128xf32>,
    } else {
    }
    %c3_i32 = arith.constant 3 : i32
    %23 = arith.cmpi slt, %arg1, %c3_i32 : i32
    %24 = arith.extui %23 : i1 to i32
    %c0_i32_12 = arith.constant 0 : i32
    %25 = arith.cmpi ne, %24, %c0_i32_12 : i32
    scf.if %25 {
      %c4_i32_60 = arith.constant 4 : i32
      %99 = arith.addi %0, %c4_i32_60 : i32
      %c16_i32_61 = arith.constant 16 : i32
      %100 = arith.muli %99, %c16_i32_61 : i32
      %101 = tpu.assume_multiple %100, 16 : i32
      %c0_62 = arith.constant 0 : index
      %102 = arith.index_cast %101 : i32 to index
      %c0_63 = arith.constant 0 : index
      %103 = vector.load %arg2[%c0_62, %102, %c0_63] : memref<1x256x128xf32, #tpu.memory_space<vmem>>, vector<1x16x128xf32>
      %104 = vector.shape_cast %103 : vector<1x16x128xf32> to vector<16x128xf32>
      %c0_64 = arith.constant 0 : index
      %c0_65 = arith.constant 0 : index
      %105 = vector.load %arg3[%c0_64, %c0_65] : memref<128x128xf32, #tpu.memory_space<vmem>>, vector<128x128xf32>
      %cst_66 = arith.constant dense<0.000000e+00> : vector<16x128xf32>
      %106 = tpu.matmul %104, %105, %cst_66 {dimension_numbers = #tpu.dot_dimension_numbers<[1], [0], [0], [1], [0, 0, 1, 1], [], []>} : vector<16x128xf32>, vector<128x128xf32>, vector<16x128xf32> -> vector<16x128xf32>
      %c0_67 = arith.constant 0 : index
      %c0_68 = arith.constant 0 : index
      %107 = vector.load %arg6[%c0_67, %c0_68] : memref<1x128xf32, #tpu.memory_space<vmem>>, vector<1x128xf32>
      %108 = vector.broadcast %107 : vector<1x128xf32> to vector<16x128xf32>
      %109 = arith.mulf %106, %108 : vector<16x128xf32>
      %c0_69 = arith.constant 0 : index
      %c0_70 = arith.constant 0 : index
      %110 = vector.load %arg7[%c0_69, %c0_70] : memref<1x128xf32, #tpu.memory_space<vmem>>, vector<1x128xf32>
      %111 = vector.broadcast %110 : vector<1x128xf32> to vector<16x128xf32>
      %112 = arith.addf %109, %111 : vector<16x128xf32>
      %cst_71 = arith.constant 0.000000e+00 : f32
      %113 = vector.broadcast %cst_71 : f32 to vector<16x128xf32>
      %114 = arith.maximumf %112, %113 : vector<16x128xf32>
      %c80 = arith.constant 80 : index
      %c0_72 = arith.constant 0 : index
      %115 = vector.load %arg13[%c80, %c0_72] : memref<96x128xf32, #tpu.memory_space<vmem>>, vector<16x128xf32>
      tpu.vector_store %arg13[%c80, %c0_72], %114 {strides = array<i32>} : memref<96x128xf32, #tpu.memory_space<vmem>>, vector<16x128xf32>,
    } else {
    }
    %c3_i32_13 = arith.constant 3 : i32
    %26 = arith.cmpi eq, %arg1, %c3_i32_13 : i32
    %27 = arith.extui %26 : i1 to i32
    %c0_i32_14 = arith.constant 0 : i32
    %28 = arith.cmpi ne, %27, %c0_i32_14 : i32
    scf.if %28 {
      %cst_60 = arith.constant 0.000000e+00 : f32
      %99 = vector.broadcast %cst_60 : f32 to vector<16x128xf32>
      %c80 = arith.constant 80 : index
      %c0_61 = arith.constant 0 : index
      %100 = vector.load %arg13[%c80, %c0_61] : memref<96x128xf32, #tpu.memory_space<vmem>>, vector<16x128xf32>
      tpu.vector_store %arg13[%c80, %c0_61], %99 {strides = array<i32>} : memref<96x128xf32, #tpu.memory_space<vmem>>, vector<16x128xf32>,
    } else {
    }
    %c0_15 = arith.constant 0 : index
    %c0_16 = arith.constant 0 : index
    %29 = vector.load %arg13[%c0_15, %c0_16] : memref<96x128xf32, #tpu.memory_space<vmem>>, vector<96x128xf32>
    %30 = tpu.iota {dimensions = array<i32: 0>} : vector<96x1xi32>
    %c16_i32_17 = arith.constant 16 : i32
    %c0_i32_18 = arith.constant 0 : i32
    %31 = arith.cmpi eq, %c16_i32_17, %c0_i32_18 : i32
    %c1_i32 = arith.constant 1 : i32
    %32 = arith.select %31, %c1_i32, %c16_i32_17 : i32
    %33 = vector.broadcast %32 : i32 to vector<96x1xi32>
    %34 = arith.remsi %30, %33 : vector<96x1xi32>
    %c0_i32_19 = arith.constant 0 : i32
    %35 = vector.broadcast %c0_i32_19 : i32 to vector<96x1xi32>
    %36 = arith.cmpi ne, %34, %35 : vector<96x1xi32>
    %c0_i32_20 = arith.constant 0 : i32
    %37 = vector.broadcast %c0_i32_20 : i32 to vector<96x1xi32>
    %38 = arith.cmpi slt, %34, %37 : vector<96x1xi32>
    %c0_i32_21 = arith.constant 0 : i32
    %39 = arith.cmpi slt, %32, %c0_i32_21 : i32
    %40 = vector.broadcast %39 : i1 to vector<96x1xi1>
    %41 = vector.broadcast %40 : vector<96x1xi1> to vector<96x1xi1>
    %42 = arith.xori %38, %41 : vector<96x1xi1>
    %43 = arith.andi %42, %36 : vector<96x1xi1>
    %44 = vector.broadcast %32 : i32 to vector<96x1xi32>
    %45 = arith.addi %34, %44 : vector<96x1xi32>
    %46 = arith.select %43, %45, %34 : vector<96x1xi1>, vector<96x1xi32>
    %cst_22 = arith.constant 0.000000e+00 : f32
    %47 = vector.broadcast %cst_22 : f32 to vector<96x128xf32>
    %c1_i32_23 = arith.constant 1 : i32
    %48 = tpu.dynamic_rotate %29 by %c1_i32_23 dim 0 : vector<96x128xf32>, i32 -> vector<96x128xf32>
    %c95_i32 = arith.constant 95 : i32
    %49 = tpu.dynamic_rotate %29 by %c95_i32 dim 0 : vector<96x128xf32>, i32 -> vector<96x128xf32>
    %c0_i32_24 = arith.constant 0 : i32
    %50 = vector.broadcast %c0_i32_24 : i32 to vector<96x1xi32>
    %51 = arith.cmpi eq, %46, %50 : vector<96x1xi32>
    %52 = vector.shape_cast %51 : vector<96x1xi1> to vector<96x1xi1>
    %53 = vector.broadcast %52 : vector<96x1xi1> to vector<96x128xi1>
    %54 = arith.select %53, %47, %48 : vector<96x128xi1>, vector<96x128xf32>
    %c0_25 = arith.constant 0 : index
    %c0_26 = arith.constant 0 : index
    %55 = vector.load %arg14[%c0_25, %c0_26] : memref<96x384xf32, #tpu.memory_space<vmem>>, vector<96x128xf32>
    tpu.vector_store %arg14[%c0_25, %c0_26], %54 {strides = array<i32>} : memref<96x384xf32, #tpu.memory_space<vmem>>, vector<96x128xf32>,
    %c0_27 = arith.constant 0 : index
    %c128 = arith.constant 128 : index
    %56 = vector.load %arg14[%c0_27, %c128] : memref<96x384xf32, #tpu.memory_space<vmem>>, vector<96x128xf32>
    tpu.vector_store %arg14[%c0_27, %c128], %29 {strides = array<i32>} : memref<96x384xf32, #tpu.memory_space<vmem>>, vector<96x128xf32>,
    %c15_i32 = arith.constant 15 : i32
    %57 = vector.broadcast %c15_i32 : i32 to vector<96x1xi32>
    %58 = arith.cmpi eq, %46, %57 : vector<96x1xi32>
    %59 = vector.shape_cast %58 : vector<96x1xi1> to vector<96x1xi1>
    %60 = vector.broadcast %59 : vector<96x1xi1> to vector<96x128xi1>
    %61 = arith.select %60, %47, %49 : vector<96x128xi1>, vector<96x128xf32>
    %c0_28 = arith.constant 0 : index
    %c256 = arith.constant 256 : index
    %62 = vector.load %arg14[%c0_28, %c256] : memref<96x384xf32, #tpu.memory_space<vmem>>, vector<96x128xf32>
    tpu.vector_store %arg14[%c0_28, %c256], %61 {strides = array<i32>} : memref<96x384xf32, #tpu.memory_space<vmem>>, vector<96x128xf32>,
    %c0_29 = arith.constant 0 : index
    %c0_30 = arith.constant 0 : index
    %63 = vector.load %arg14[%c0_29, %c0_30] : memref<96x384xf32, #tpu.memory_space<vmem>>, vector<64x384xf32>
    %c0_31 = arith.constant 0 : index
    %c0_32 = arith.constant 0 : index
    %c0_33 = arith.constant 0 : index
    %64 = vector.load %arg4[%c0_31, %c0_32, %c0_33] : memref<3x384x128xf32, #tpu.memory_space<vmem>>, vector<1x384x128xf32>
    %65 = vector.shape_cast %64 : vector<1x384x128xf32> to vector<384x128xf32>
    %cst_34 = arith.constant dense<0.000000e+00> : vector<64x128xf32>
    %66 = tpu.matmul %63, %65, %cst_34 {dimension_numbers = #tpu.dot_dimension_numbers<[1], [0], [0], [1], [0, 0, 1, 1], [], []>} : vector<64x384xf32>, vector<384x128xf32>, vector<64x128xf32> -> vector<64x128xf32>
    %c16_35 = arith.constant 16 : index
    %c0_36 = arith.constant 0 : index
    %67 = vector.load %arg14[%c16_35, %c0_36] : memref<96x384xf32, #tpu.memory_space<vmem>>, vector<64x384xf32>
    %c1 = arith.constant 1 : index
    %c0_37 = arith.constant 0 : index
    %c0_38 = arith.constant 0 : index
    %68 = vector.load %arg4[%c1, %c0_37, %c0_38] : memref<3x384x128xf32, #tpu.memory_space<vmem>>, vector<1x384x128xf32>
    %69 = vector.shape_cast %68 : vector<1x384x128xf32> to vector<384x128xf32>
    %cst_39 = arith.constant dense<0.000000e+00> : vector<64x128xf32>
    %70 = tpu.matmul %67, %69, %cst_39 {dimension_numbers = #tpu.dot_dimension_numbers<[1], [0], [0], [1], [0, 0, 1, 1], [], []>} : vector<64x384xf32>, vector<384x128xf32>, vector<64x128xf32> -> vector<64x128xf32>
    %71 = arith.addf %66, %70 : vector<64x128xf32>
    %c32 = arith.constant 32 : index
    %c0_40 = arith.constant 0 : index
    %72 = vector.load %arg14[%c32, %c0_40] : memref<96x384xf32, #tpu.memory_space<vmem>>, vector<64x384xf32>
    %c2 = arith.constant 2 : index
    %c0_41 = arith.constant 0 : index
    %c0_42 = arith.constant 0 : index
    %73 = vector.load %arg4[%c2, %c0_41, %c0_42] : memref<3x384x128xf32, #tpu.memory_space<vmem>>, vector<1x384x128xf32>
    %74 = vector.shape_cast %73 : vector<1x384x128xf32> to vector<384x128xf32>
    %cst_43 = arith.constant dense<0.000000e+00> : vector<64x128xf32>
    %75 = tpu.matmul %72, %74, %cst_43 {dimension_numbers = #tpu.dot_dimension_numbers<[1], [0], [0], [1], [0, 0, 1, 1], [], []>} : vector<64x384xf32>, vector<384x128xf32>, vector<64x128xf32> -> vector<64x128xf32>
    %76 = arith.addf %71, %75 : vector<64x128xf32>
    %c0_44 = arith.constant 0 : index
    %c0_45 = arith.constant 0 : index
    %77 = vector.load %arg8[%c0_44, %c0_45] : memref<1x128xf32, #tpu.memory_space<vmem>>, vector<1x128xf32>
    %78 = vector.broadcast %77 : vector<1x128xf32> to vector<64x128xf32>
    %79 = arith.mulf %76, %78 : vector<64x128xf32>
    %c0_46 = arith.constant 0 : index
    %c0_47 = arith.constant 0 : index
    %80 = vector.load %arg9[%c0_46, %c0_47] : memref<1x128xf32, #tpu.memory_space<vmem>>, vector<1x128xf32>
    %81 = vector.broadcast %80 : vector<1x128xf32> to vector<64x128xf32>
    %82 = arith.addf %79, %81 : vector<64x128xf32>
    %cst_48 = arith.constant 0.000000e+00 : f32
    %83 = vector.broadcast %cst_48 : f32 to vector<64x128xf32>
    %84 = arith.maximumf %82, %83 : vector<64x128xf32>
    %c0_49 = arith.constant 0 : index
    %c0_50 = arith.constant 0 : index
    %85 = vector.load %arg5[%c0_49, %c0_50] : memref<128x128xf32, #tpu.memory_space<vmem>>, vector<128x128xf32>
    %cst_51 = arith.constant dense<0.000000e+00> : vector<64x128xf32>
    %86 = tpu.matmul %84, %85, %cst_51 {dimension_numbers = #tpu.dot_dimension_numbers<[1], [0], [0], [1], [0, 0, 1, 1], [], []>} : vector<64x128xf32>, vector<128x128xf32>, vector<64x128xf32> -> vector<64x128xf32>
    %c0_52 = arith.constant 0 : index
    %c0_53 = arith.constant 0 : index
    %87 = vector.load %arg10[%c0_52, %c0_53] : memref<1x128xf32, #tpu.memory_space<vmem>>, vector<1x128xf32>
    %88 = vector.broadcast %87 : vector<1x128xf32> to vector<64x128xf32>
    %89 = arith.mulf %86, %88 : vector<64x128xf32>
    %c0_54 = arith.constant 0 : index
    %c0_55 = arith.constant 0 : index
    %90 = vector.load %arg11[%c0_54, %c0_55] : memref<1x128xf32, #tpu.memory_space<vmem>>, vector<1x128xf32>
    %91 = vector.broadcast %90 : vector<1x128xf32> to vector<64x128xf32>
    %92 = arith.addf %89, %91 : vector<64x128xf32>
    %93 = arith.addf %92, %5 : vector<64x128xf32>
    %cst_56 = arith.constant 0.000000e+00 : f32
    %94 = vector.broadcast %cst_56 : f32 to vector<64x128xf32>
    %95 = arith.maximumf %93, %94 : vector<64x128xf32>
    %c0_57 = arith.constant 0 : index
    %c0_58 = arith.constant 0 : index
    %c0_59 = arith.constant 0 : index
    %96 = vector.load %arg12[%c0_57, %c0_58, %c0_59] : memref<1x64x128xf32, #tpu.memory_space<vmem>>, vector<1x64x128xf32>
    %97 = vector.shape_cast %96 : vector<1x64x128xf32> to vector<64x128xf32>
    %98 = vector.shape_cast %95 : vector<64x128xf32> to vector<1x64x128xf32>
    tpu.vector_store %arg12[%c0_57, %c0_58, %c0_59], %98 {strides = array<i32>} : memref<1x64x128xf32, #tpu.memory_space<vmem>>, vector<1x64x128xf32>,
    return
  }
  func.func @transform_0(%arg0: i32, %arg1: i32) -> (i32, i32, i32) {
    %c0_i32 = arith.constant 0 : i32
    %c0_i32_0 = arith.constant 0 : i32
    %c0_i32_1 = arith.constant 0 : i32
    return %arg0, %c0_i32, %c0_i32_0 : i32, i32, i32
  }
  func.func @transform_1(%arg0: i32, %arg1: i32) -> (i32, i32) {
    %c0_i32 = arith.constant 0 : i32
    %c0_i32_0 = arith.constant 0 : i32
    %c0_i32_1 = arith.constant 0 : i32
    return %c0_i32, %c0_i32_0 : i32, i32
  }
  func.func @transform_2(%arg0: i32, %arg1: i32) -> (i32, i32, i32) {
    %c0_i32 = arith.constant 0 : i32
    %c0_i32_0 = arith.constant 0 : i32
    %c0_i32_1 = arith.constant 0 : i32
    %c0_i32_2 = arith.constant 0 : i32
    return %c0_i32, %c0_i32_0, %c0_i32_1 : i32, i32, i32
  }
  func.func @transform_3(%arg0: i32, %arg1: i32) -> (i32, i32) {
    %c0_i32 = arith.constant 0 : i32
    %c0_i32_0 = arith.constant 0 : i32
    %c0_i32_1 = arith.constant 0 : i32
    return %c0_i32, %c0_i32_0 : i32, i32
  }
  func.func @transform_4(%arg0: i32, %arg1: i32) -> (i32, i32) {
    %c0_i32 = arith.constant 0 : i32
    %c0_i32_0 = arith.constant 0 : i32
    %c0_i32_1 = arith.constant 0 : i32
    return %c0_i32, %c0_i32_0 : i32, i32
  }
  func.func @transform_5(%arg0: i32, %arg1: i32) -> (i32, i32) {
    %c0_i32 = arith.constant 0 : i32
    %c0_i32_0 = arith.constant 0 : i32
    %c0_i32_1 = arith.constant 0 : i32
    return %c0_i32, %c0_i32_0 : i32, i32
  }
  func.func @transform_6(%arg0: i32, %arg1: i32) -> (i32, i32) {
    %c0_i32 = arith.constant 0 : i32
    %c0_i32_0 = arith.constant 0 : i32
    %c0_i32_1 = arith.constant 0 : i32
    return %c0_i32, %c0_i32_0 : i32, i32
  }
  func.func @transform_7(%arg0: i32, %arg1: i32) -> (i32, i32) {
    %c0_i32 = arith.constant 0 : i32
    %c0_i32_0 = arith.constant 0 : i32
    %c0_i32_1 = arith.constant 0 : i32
    return %c0_i32, %c0_i32_0 : i32, i32
  }
  func.func @transform_8(%arg0: i32, %arg1: i32) -> (i32, i32) {
    %c0_i32 = arith.constant 0 : i32
    %c0_i32_0 = arith.constant 0 : i32
    %c0_i32_1 = arith.constant 0 : i32
    return %c0_i32, %c0_i32_0 : i32, i32
  }
  func.func @transform_9(%arg0: i32, %arg1: i32) -> (i32, i32) {
    %c0_i32 = arith.constant 0 : i32
    %c0_i32_0 = arith.constant 0 : i32
    %c0_i32_1 = arith.constant 0 : i32
    return %c0_i32, %c0_i32_0 : i32, i32
  }
  func.func @transform_10(%arg0: i32, %arg1: i32) -> (i32, i32, i32) {
    %c0_i32 = arith.constant 0 : i32
    %c0_i32_0 = arith.constant 0 : i32
    return %arg0, %arg1, %c0_i32 : i32, i32, i32
  }
}

</mosaic_0001>

<bundles_post_ra>
// kernel: bottleneck_forward.1
= control target key start
LH: loop header
LB: loop body
LE: loop exit
PB: predicated region body
PF: predicated region fallthrough
CT: control target
= control target key end

     0   :  { %s3601_s0 = inlined_call_operand.vmem [shape: f32[2,256,128], index: 0, kind: input, shape index: {}]   ;;  %s3602_s1 = inlined_call_operand.vmem [shape: f32[128,128], index: 1, kind: input, shape index: {}]   ;;  %s3603_s2 = inlined_call_operand.vmem [shape: f32[3,384,128], index: 2, kind: input, shape index: {}]   ;;  %s3604_s3 = inlined_call_operand.vmem [shape: f32[128,128], index: 3, kind: input, shape index: {}]   ;;  %s3605_s4 = inlined_call_operand.vmem [shape: f32[1,128], index: 4, kind: input, shape index: {}]   ;;  %s3606_s5 = inlined_call_operand.vmem [shape: f32[1,128], index: 5, kind: input, shape index: {}]   ;;  %s3607_s6 = inlined_call_operand.vmem [shape: f32[1,128], index: 6, kind: input, shape index: {}]   ;;  %s3608_s7 = inlined_call_operand.vmem [shape: f32[1,128], index: 7, kind: input, shape index: {}]   ;;  %s3609_s8 = inlined_call_operand.vmem [shape: f32[1,128], index: 8, kind: input, shape index: {}]   ;;  %s3610_s9 = inlined_call_operand.vmem [shape: f32[1,128], index: 9, kind: input, shape index: {}]   ;;  %s3611_s10 = inlined_call_operand.hbm [shape: f32[2,256,128], index: 10, kind: output, shape index: {}]  }
   0x1   :  { %3618 = sst [smem:[#allocation13_spill]] %s3601_s0 }
   0x2   :  { %15 = vsyncpa [#allocation5], 0 }
   0x3   :  { %17 = vsyncpa [#allocation5 + $0x1], 0  ;;  %s2324_s13 = smov 0   ;;  %s2326_s14 = smov 0  }
   0x4   :  { %s2328_s15 = smov 0   ;;  %s2330_s16 = smov 0  }
   0x5   :  { %s2332_s17 = smov 0   ;;  %s2334_s18 = smov 0  }
   0x6   :  { %s2336_s19 = smov 0   ;;  %s2338_s20 = smov 0  }
   0x7 LB: > { %3619 = sst [smem:[#allocation7_spill]] %s2243_s15  ;;  %s1788_s21 = sadd.s32 4294967295, %s2263_s20   ;;  %s2263_s20 = sphi %s2338_s20, %s23_s20   ;;  %s2259_s19 = sphi %s2336_s19, %s3651_s19   ;;  %s2255_s18 = sphi %s2334_s18, %s3650_s18   ;;  %s2251_s17 = sphi %s2332_s17, %s3649_s17   ;;  %s2247_s16 = sphi %s2330_s16, %s3648_s16   ;;  %s2243_s15 = sphi %s2328_s15, %s3647_s15   ;;  %s2239_s14 = sphi %s2326_s14, %s3653_s14   ;;  %s2235_s13 = sphi %s2324_s13, %s3652_s13  }
   0x8   : > { %3620 = sst [smem:[#allocation8_spill]] %s2255_s18  ;;  %s1789_s22 = sadd.s32 4294967294, %s2263_s20  }
   0x9   : > { %3621 = sst [smem:[#allocation9_spill]] %s2259_s19  ;;  %s32_s23 = sadd.s32 1, %s2255_s18 }
   0xa   : > { %p33_p0 = scmp.ge.s32.totalorder %s32_s23, 4  ;;  %s35_s24 = sadd.s32 1, %s2259_s19 }
   0xb   : > { %p269_p1 = scmp.ne.s32.totalorder %s2243_s15, %s2239_s14  ;;  %p270_p2 = scmp.eq.s32.totalorder %s1788_s21, 7 }
   0xc   : > { %s3655_s23 = smov (%p33_p0, %s32_s23), 0  ;;  %s3657_s24 = smov (!%p33_p0, %s35_s24), %s2259_s19 }
   0xd   : > { %3622 = sst [smem:[#allocation10_spill]] %s3655_s23  ;;  %s255_s25 = ssub.s32 %s2255_s18, %s3655_s23 }
   0xe   : > { %p2375_p3 = por %p270_p2, %p269_p1  ;;  %p37_p4 = scmp.ge.s32.totalorder %s3657_s24, 2 }
   0xf   : > { %p275_p5 = scmp.ne.s32.totalorder %s2239_s14, %s2235_s13  ;;  %p276_p6 = scmp.eq.s32.totalorder %s1789_s22, 7 }
  0x10   : > { %p1792_p7 = scmp.ge.s32.totalorder %s2263_s20, 1  ;;  %s3659_s24 = smov (%p37_p4, %s3657_s24), 0 }
  0x11   : > { %3624 = sst [smem:[#allocation11_spill]] %s3659_s24  ;;  %p2384_p8 = por %p276_p6, %p275_p5 }
  0x12   : > { %p329_p9 = scmp.lt.s32.totalorder %s2263_s20, 9  ;;  %s254_s28 = ssub.s32 %s2259_s19, %s3659_s24 }
  0x13   : > { %s259_s29 = sadd.s32 1, %s2243_s15  ;;  %s256_s30 = sor.u32 %s255_s25, %s254_s28 }
  0x14   : > { %p330_p10 = pnand %p1792_p7, %p329_p9  ;;  %p257_p11 = scmp.eq.s32.totalorder %s256_s30, 0 }
  0x15   : > { %s3615_s18 = sand.u32 (!%p330_p10), 1, %s2239_s14   ;;  %p367_p12 = scmp.lt.s32.totalorder (!%p330_p10), %s2251_s17, 1 }
  0x16   : > { %s2393_s11 = scalar_select %p257_p11, %s2243_s15, %s259_s29  }
  0x17   : > { %333 = sbr.rel (%p330_p10) target bundleno = 1038 (0x40e), region = 60  ;;  %s2405_s25 = sshll.u32 (!%p330_p10), %s3615_s18, 6 }
  0x18   : > { %3626 = sst [smem:[#allocation12_spill]] %s2393_s11  ;;  %s1797_s21 = sshll.u32 (!%p330_p10), %s2247_s16, 6 }
  0x19   : > { %s3627_s0 = sld [smem:[#allocation13_spill]] (!%p330_p10)  ;;  %s2499_s18 = scalar_lea.vmem (!%p330_p10), [#allocation4], %s2405_s25 }
  0x1a   : > { %p1798_p13 = scmp.le.s32.totalorder (!%p330_p10), %s2247_s16, 0 }
  0x1c   : > { %v399_v0 = vld [vmem:[%s3602_s1 + $0x78] sm:$0xff]  ;;  %v398_v1 = vld [vmem:[%s3602_s1 + $0x70] sm:$0xff]  ;;  %v397_v2 = vld [vmem:[%s3602_s1 + $0x68] sm:$0xff]  ;;  %s368_s30 = scalar_select %p367_p12, %s2251_s17, 1 }
  0x1d   : > { %1961 = vmatpush.msra.mxu2 %v399_v0  ;;  %1962 = vmatpush.msra.mxu3 %v399_v0  ;;  %v396_v3 = vld [vmem:[%s3602_s1 + $0x60] sm:$0xff]  ;;  %v395_v4 = vld [vmem:[%s3602_s1 + $0x58] sm:$0xff]  ;;  %v394_v5 = vld [vmem:[%s3602_s1 + $0x50] sm:$0xff] }
  0x1e   : > { %400 = vmatpush.msra.mxu0 %v399_v0  ;;  %1960 = vmatpush.msra.mxu1 %v399_v0  ;;  %v393_v6 = vld [vmem:[%s3602_s1 + $0x48] sm:$0xff]  ;;  %v392_v7 = vld [vmem:[%s3602_s1 + $0x40] sm:$0xff]  ;;  %v391_v8 = vld [vmem:[%s3602_s1 + $0x38] sm:$0xff]  ;;  %s1910_s28 = sshll.u32 %s368_s30, 8  ;;  %s3628_s30 = sshll.u32 (!%p1798_p13), %s2247_s16, 2 }
  0x1f   : > { %1964 = vmatpush.msra.mxu2 %v398_v1  ;;  %1965 = vmatpush.msra.mxu3 %v398_v1  ;;  %v390_v9 = vld [vmem:[%s3602_s1 + $0x30] sm:$0xff]  ;;  %v389_v10 = vld [vmem:[%s3602_s1 + $0x28] sm:$0xff]  ;;  %v388_v11 = vld [vmem:[%s3602_s1 + $0x20] sm:$0xff]  ;;  %s2445_s24 = scalar_lea.vmem %s3627_s0, %s1910_s28  ;;  %s1799_s19 = sadd.s32 (!%p1798_p13), 4294967295, %s3628_s30 }
  0x20   : > { %401 = vmatpush.msra.mxu0 %v398_v1  ;;  %1963 = vmatpush.msra.mxu1 %v398_v1  ;;  %v387_v12 = vld [vmem:[%s3602_s1 + $0x18] sm:$0xff]  ;;  %v386_v13 = vld [vmem:[%s3602_s1 + $0x10] sm:$0xff]  ;;  %v385_v14 = vld [vmem:[%s3602_s1 + $0x8] sm:$0xff]  ;;  %s2455_s29 = scalar_lea.vmem %s2445_s24, %s1797_s21  ;;  %s1800_s12 = sshll.u32 (!%p1798_p13), %s1799_s19, 4 }
  0x21   : > { %1967 = vmatpush.msra.mxu2 %v397_v2  ;;  %1968 = vmatpush.msra.mxu3 %v397_v2  ;;  %v384_v15 = vld [vmem:[%s3602_s1] sm:$0xff]  ;;  %v2464_v17 = vld [vmem:[%s2455_s29 + $0x30] sm:$0xff]  ;;  %v2477_v20 = vld [vmem:[%s2455_s29 + $0x28] sm:$0xff]  ;;  %s487_s22 = scalar_lea.vmem (!%p1798_p13), %s2445_s24, %s1800_s12 }
  0x22   : > { %402 = vmatpush.msra.mxu0 %v397_v2  ;;  %1966 = vmatpush.msra.mxu1 %v397_v2  ;;  %v2461_v16 = vld [vmem:[%s2455_s29 + $0x20] sm:$0xff]  ;;  %v2470_v19 = vld [vmem:[%s2455_s29 + $0x10] sm:$0xff]  ;;  %v2480_v21 = vld [vmem:[%s2455_s29 + $0x38] sm:$0xff] }
  0x23   : > { %1970 = vmatpush.msra.mxu2 %v396_v3  ;;  %1971 = vmatpush.msra.mxu3 %v396_v3  ;;  %v2467_v18 = vld [vmem:[%s2455_s29] sm:$0xff]  ;;  %v2483_v22 = vld [vmem:[%s2455_s29 + $0x8] sm:$0xff]  ;;  %v2486_v23 = vld [vmem:[%s2455_s29 + $0x18] sm:$0xff] }
  0x24   : > { %403 = vmatpush.msra.mxu0 %v396_v3  ;;  %1969 = vmatpush.msra.mxu1 %v396_v3  ;;  %v2159_v24 = vld [vmem:[%s3605_s4] ss:$0 sm:$0xff] }
  0x25   : > { %1973 = vmatpush.msra.mxu2 %v395_v4  ;;  %1974 = vmatpush.msra.mxu3 %v395_v4  ;;  %v2160_v25 = vld [vmem:[%s3606_s5] ss:$0 sm:$0xff] }
  0x26   : > { %404 = vmatpush.msra.mxu0 %v395_v4  ;;  %1972 = vmatpush.msra.mxu1 %v395_v4 }
  0x27   : > { %1976 = vmatpush.msra.mxu2 %v394_v5  ;;  %1977 = vmatpush.msra.mxu3 %v394_v5 }
  0x28   : > { %405 = vmatpush.msra.mxu0 %v394_v5  ;;  %1975 = vmatpush.msra.mxu1 %v394_v5 }
  0x29   : > { %1979 = vmatpush.msra.mxu2 %v393_v6  ;;  %1980 = vmatpush.msra.mxu3 %v393_v6 }
  0x2a   : > { %406 = vmatpush.msra.mxu0 %v393_v6  ;;  %1978 = vmatpush.msra.mxu1 %v393_v6 }
  0x2b   : > { %1982 = vmatpush.msra.mxu2 %v392_v7  ;;  %1983 = vmatpush.msra.mxu3 %v392_v7 }
  0x2c   : > { %407 = vmatpush.msra.mxu0 %v392_v7  ;;  %1981 = vmatpush.msra.mxu1 %v392_v7 }
  0x2d   : > { %1985 = vmatpush.msra.mxu2 %v391_v8  ;;  %1986 = vmatpush.msra.mxu3 %v391_v8 }
  0x2e   : > { %408 = vmatpush.msra.mxu0 %v391_v8  ;;  %1984 = vmatpush.msra.mxu1 %v391_v8 }
  0x2f   : > { %1988 = vmatpush.msra.mxu2 %v390_v9  ;;  %1989 = vmatpush.msra.mxu3 %v390_v9 }
  0x30   : > { %409 = vmatpush.msra.mxu0 %v390_v9  ;;  %1987 = vmatpush.msra.mxu1 %v390_v9 }
  0x31   : > { %1991 = vmatpush.msra.mxu2 %v389_v10  ;;  %1992 = vmatpush.msra.mxu3 %v389_v10 }
  0x32   : > { %410 = vmatpush.msra.mxu0 %v389_v10  ;;  %1990 = vmatpush.msra.mxu1 %v389_v10 }
  0x33   : > { %1994 = vmatpush.msra.mxu2 %v388_v11  ;;  %1995 = vmatpush.msra.mxu3 %v388_v11 }
  0x34   : > { %411 = vmatpush.msra.mxu0 %v388_v11  ;;  %1993 = vmatpush.msra.mxu1 %v388_v11 }
  0x35   : > { %1997 = vmatpush.msra.mxu2 %v387_v12  ;;  %1998 = vmatpush.msra.mxu3 %v387_v12 }
  0x36   : > { %412 = vmatpush.msra.mxu0 %v387_v12  ;;  %1996 = vmatpush.msra.mxu1 %v387_v12 }
  0x37   : > { %2000 = vmatpush.msra.mxu2 %v386_v13  ;;  %2001 = vmatpush.msra.mxu3 %v386_v13 }
  0x38   : > { %413 = vmatpush.msra.mxu0 %v386_v13  ;;  %1999 = vmatpush.msra.mxu1 %v386_v13 }
  0x39   : > { %2003 = vmatpush.msra.mxu2 %v385_v14  ;;  %2004 = vmatpush.msra.mxu3 %v385_v14 }
  0x3a   : > { %414 = vmatpush.msra.mxu0 %v385_v14  ;;  %2002 = vmatpush.msra.mxu1 %v385_v14 }
  0x3b   : > { %2006 = vmatpush.msra.mxu2 %v384_v15  ;;  %2007 = vmatpush.msra.mxu3 %v384_v15 }
  0x3c   : > { %428 = vmatmul.f32.vlgmr.msra.gmra.mxu2 %v2461_v16  ;;  %434 = vmatmul.f32.vlgmr.msra.gmra.mxu3 %v2464_v17 }
  0x3d   : > { %415 = vmatpush.msra.mxu0 %v384_v15  ;;  %2005 = vmatpush.msra.mxu1 %v384_v15 }
  0x3e   : > { %416 = vmatmul.f32.vlgmr.msra.gmra.mxu0 %v2467_v18  ;;  %422 = vmatmul.f32.vlgmr.msra.gmra.mxu1 %v2470_v19 }
  0x44   : > { %431 = vmatmul.f32.gmra.mxu2 %v2477_v20  ;;  %437 = vmatmul.f32.gmra.mxu3 %v2480_v21 }
  0x46   : > { %419 = vmatmul.f32.gmra.mxu0 %v2483_v22  ;;  %425 = vmatmul.f32.gmra.mxu1 %v2486_v23 }
  0xbb   : > { %v417_v26 = vpop.f32.mrf.mxu0  ;;  %v423_v27 = vpop.f32.mrf.mxu1 }
  0xbc   : > { %v445_v28 = vmul.f32 %v2159_v24, %v417_v26  ;;  %v447_v29 = vmul.f32 %v2159_v24, %v423_v27 }
  0xbe   : > { %v457_v30 = vadd.f32 %v2160_v25, %v445_v28  ;;  %v459_v31 = vadd.f32 %v2160_v25, %v447_v29 }
  0xbf   : > { %v429_v32 = vpop.f32.mrf.mxu2  ;;  %v435_v33 = vpop.f32.mrf.mxu3 }
  0xc0   : > { %v465_v34 = vmax.f32 %v457_v30, 0.0  ;;  %v467_v35 = vmax.f32 %v459_v31, 0.0  ;;  %v449_v36 = vmul.f32 %v2159_v24, %v429_v32  ;;  %v451_v37 = vmul.f32 %v2159_v24, %v435_v33 }
  0xc2   : > { %473 = vst [vmem:[#allocation2 + $0x40] sm:$0xff] %v465_v34  ;;  %v461_v38 = vadd.f32 %v2160_v25, %v449_v36  ;;  %v463_v39 = vadd.f32 %v2160_v25, %v451_v37 }
  0xc3   : > { %475 = vst [vmem:[#allocation2 + $0x58] sm:$0xff] %v467_v35  ;;  %v420_v40 = vpop.f32.mrf.mxu0  ;;  %v426_v41 = vpop.f32.mrf.mxu1 }
  0xc4   : > { %v469_v42 = vmax.f32 %v461_v38, 0.0  ;;  %v471_v43 = vmax.f32 %v463_v39, 0.0  ;;  %v446_v44 = vmul.f32 %v2159_v24, %v420_v40  ;;  %v448_v45 = vmul.f32 %v2159_v24, %v426_v41 }
  0xc6   : > { %477 = vst [vmem:[#allocation2 + $0x50] sm:$0xff] %v469_v42  ;;  %v458_v46 = vadd.f32 %v2160_v25, %v446_v44  ;;  %v460_v47 = vadd.f32 %v2160_v25, %v448_v45 }
  0xc7   : > { %479 = vst [vmem:[#allocation2 + $0x18] sm:$0xff] %v471_v43  ;;  %v432_v48 = vpop.f32.mrf.mxu2  ;;  %v438_v49 = vpop.f32.mrf.mxu3 }
  0xc8   : > { %v466_v50 = vmax.f32 %v458_v46, 0.0  ;;  %v468_v51 = vmax.f32 %v460_v47, 0.0  ;;  %v450_v52 = vmul.f32 %v2159_v24, %v432_v48  ;;  %v452_v53 = vmul.f32 %v2159_v24, %v438_v49 }
  0xca   : > { %474 = vst [vmem:[#allocation2 + $0x10] sm:$0xff] %v466_v50  ;;  %v462_v54 = vadd.f32 %v2160_v25, %v450_v52  ;;  %v464_v55 = vadd.f32 %v2160_v25, %v452_v53 }
  0xcb   : > { %476 = vst [vmem:[#allocation2 + $0x28] sm:$0xff] %v468_v51  ;;  %484 = sbr.rel (%p1798_p13) target bundleno = 374 (0x176), region = 64 }
  0xcc   : > { %v470_v56 = vmax.f32 %v462_v54, 0.0  ;;  %v472_v57 = vmax.f32 %v464_v55, 0.0 }
  0xce   : > { %478 = vst [vmem:[#allocation2 + $0x30] sm:$0xff] %v470_v56 }
  0xcf   : > { %480 = vst [vmem:[#allocation2 + $0x48] sm:$0xff] %v472_v57 }
  0xd0   : > { %v505_v58 = vld [vmem:[%s3602_s1 + $0x78] sm:$0xff]  ;;  %v504_v59 = vld [vmem:[%s3602_s1 + $0x70] sm:$0xff]  ;;  %v503_v60 = vld [vmem:[%s3602_s1 + $0x68] sm:$0xff] }
  0xd1   : > { %506 = vmatpush.msra.mxu0 %v505_v58  ;;  %2008 = vmatpush.msra.mxu1 %v505_v58  ;;  %v502_v61 = vld [vmem:[%s3602_s1 + $0x60] sm:$0xff]  ;;  %v501_v62 = vld [vmem:[%s3602_s1 + $0x58] sm:$0xff]  ;;  %v500_v63 = vld [vmem:[%s3602_s1 + $0x50] sm:$0xff] }
  0xd2   : > { %v499_v0 = vld [vmem:[%s3602_s1 + $0x48] sm:$0xff]  ;;  %v498_v1 = vld [vmem:[%s3602_s1 + $0x40] sm:$0xff]  ;;  %v497_v2 = vld [vmem:[%s3602_s1 + $0x38] sm:$0xff] }
  0xd3   : > { %507 = vmatpush.msra.mxu0 %v504_v59  ;;  %2009 = vmatpush.msra.mxu1 %v504_v59  ;;  %v496_v3 = vld [vmem:[%s3602_s1 + $0x30] sm:$0xff]  ;;  %v495_v4 = vld [vmem:[%s3602_s1 + $0x28] sm:$0xff]  ;;  %v494_v5 = vld [vmem:[%s3602_s1 + $0x20] sm:$0xff] }
  0xd4   : > { %v493_v6 = vld [vmem:[%s3602_s1 + $0x18] sm:$0xff]  ;;  %v492_v7 = vld [vmem:[%s3602_s1 + $0x10] sm:$0xff]  ;;  %v491_v8 = vld [vmem:[%s3602_s1 + $0x8] sm:$0xff] }
  0xd5   : > { %508 = vmatpush.msra.mxu0 %v503_v60  ;;  %2010 = vmatpush.msra.mxu1 %v503_v60  ;;  %v490_v9 = vld [vmem:[%s3602_s1] sm:$0xff]  ;;  %v489_v11 = vld [vmem:[%s487_s22 + $0x8] sm:$0xff] }
  0xd6   : > { %v488_v10 = vld [vmem:[%s487_s22] sm:$0xff] }
  0xd7   : > { %509 = vmatpush.msra.mxu0 %v502_v61  ;;  %2011 = vmatpush.msra.mxu1 %v502_v61  ;;  %v2161_v12 = vld [vmem:[%s3605_s4] ss:$0 sm:$0xff] }
  0xd8   : > { %v2162_v13 = vld [vmem:[%s3606_s5] ss:$0 sm:$0xff] }
  0xd9   : > { %510 = vmatpush.msra.mxu0 %v501_v62  ;;  %2012 = vmatpush.msra.mxu1 %v501_v62 }
  0xdb   : > { %511 = vmatpush.msra.mxu0 %v500_v63  ;;  %2013 = vmatpush.msra.mxu1 %v500_v63 }
  0xdd   : > { %512 = vmatpush.msra.mxu0 %v499_v0  ;;  %2014 = vmatpush.msra.mxu1 %v499_v0 }
  0xdf   : > { %513 = vmatpush.msra.mxu0 %v498_v1  ;;  %2015 = vmatpush.msra.mxu1 %v498_v1 }
  0xe1   : > { %514 = vmatpush.msra.mxu0 %v497_v2  ;;  %2016 = vmatpush.msra.mxu1 %v497_v2 }
  0xe3   : > { %515 = vmatpush.msra.mxu0 %v496_v3  ;;  %2017 = vmatpush.msra.mxu1 %v496_v3 }
  0xe5   : > { %516 = vmatpush.msra.mxu0 %v495_v4  ;;  %2018 = vmatpush.msra.mxu1 %v495_v4 }
  0xe7   : > { %517 = vmatpush.msra.mxu0 %v494_v5  ;;  %2019 = vmatpush.msra.mxu1 %v494_v5 }
  0xe9   : > { %518 = vmatpush.msra.mxu0 %v493_v6  ;;  %2020 = vmatpush.msra.mxu1 %v493_v6 }
  0xeb   : > { %519 = vmatpush.msra.mxu0 %v492_v7  ;;  %2021 = vmatpush.msra.mxu1 %v492_v7 }
  0xed   : > { %520 = vmatpush.msra.mxu0 %v491_v8  ;;  %2022 = vmatpush.msra.mxu1 %v491_v8 }
  0xef   : > { %521 = vmatpush.msra.mxu0 %v490_v9  ;;  %2023 = vmatpush.msra.mxu1 %v490_v9 }
  0xf0   : > { %522 = vmatmul.f32.vlgmr.msra.gmra.mxu0 %v488_v10  ;;  %525 = vmatmul.f32.vlgmr.msra.gmra.mxu1 %v489_v11 }
 0x16d   : > { %v523_v14 = vpop.f32.mrf.mxu0  ;;  %v526_v15 = vpop.f32.mrf.mxu1 }
 0x16e   : > { %v533_v24 = vmul.f32 %v2161_v12, %v523_v14  ;;  %v534_v25 = vmul.f32 %v2161_v12, %v526_v15 }
 0x170   : > { %v539_v26 = vadd.f32 %v2162_v13, %v533_v24  ;;  %v540_v27 = vadd.f32 %v2162_v13, %v534_v25 }
 0x172   : > { %v541_v28 = vmax.f32 %v539_v26, 0.0  ;;  %v542_v29 = vmax.f32 %v540_v27, 0.0 }
 0x174   : > { %543 = vst [vmem:[#allocation2 + $0x38] sm:$0xff] %v541_v28 }
 0x175   : > { %544 = vst [vmem:[#allocation2 + $0x8] sm:$0xff] %v542_v29 }
 0x176 PF: > { %p1801_p0 = scmp.ne.s32.totalorder %s2247_s16, 0 }
 0x178   : > { %548 = sbr.rel (%p1801_p0) target bundleno = 384 (0x180), region = 68 }
 0x17d   : > { %v2265_v30 = vmov 0.0  }
 0x17e   : > { %549 = vst [vmem:[#allocation2 + $0x38] sm:$0xff] %v2265_v30 }
 0x17f   : > { %550 = vst [vmem:[#allocation2 + $0x8] sm:$0xff] %v2265_v30 }
 0x180 PF: > { %p1802_p1 = scmp.ge.s32.totalorder %s2247_s16, 3 }
 0x182   : > { %554 = sbr.rel (%p1802_p1) target bundleno = 557 (0x22d), region = 72 }
 0x187   : > { %v575_v31 = vld [vmem:[%s3602_s1 + $0x78] sm:$0xff]  ;;  %v574_v32 = vld [vmem:[%s3602_s1 + $0x70] sm:$0xff]  ;;  %v573_v33 = vld [vmem:[%s3602_s1 + $0x68] sm:$0xff] }
 0x188   : > { %576 = vmatpush.msra.mxu0 %v575_v31  ;;  %2024 = vmatpush.msra.mxu1 %v575_v31  ;;  %v572_v34 = vld [vmem:[%s3602_s1 + $0x60] sm:$0xff]  ;;  %v571_v35 = vld [vmem:[%s3602_s1 + $0x58] sm:$0xff]  ;;  %v570_v36 = vld [vmem:[%s3602_s1 + $0x50] sm:$0xff] }
 0x189   : > { %v569_v37 = vld [vmem:[%s3602_s1 + $0x48] sm:$0xff]  ;;  %v568_v38 = vld [vmem:[%s3602_s1 + $0x40] sm:$0xff]  ;;  %v567_v39 = vld [vmem:[%s3602_s1 + $0x38] sm:$0xff] }
 0x18a   : > { %577 = vmatpush.msra.mxu0 %v574_v32  ;;  %2025 = vmatpush.msra.mxu1 %v574_v32  ;;  %v566_v40 = vld [vmem:[%s3602_s1 + $0x30] sm:$0xff]  ;;  %v565_v41 = vld [vmem:[%s3602_s1 + $0x28] sm:$0xff]  ;;  %v564_v42 = vld [vmem:[%s3602_s1 + $0x20] sm:$0xff] }
 0x18b   : > { %v563_v43 = vld [vmem:[%s3602_s1 + $0x18] sm:$0xff]  ;;  %v562_v44 = vld [vmem:[%s3602_s1 + $0x10] sm:$0xff]  ;;  %v561_v45 = vld [vmem:[%s3602_s1 + $0x8] sm:$0xff] }
 0x18c   : > { %578 = vmatpush.msra.mxu0 %v573_v33  ;;  %2026 = vmatpush.msra.mxu1 %v573_v33  ;;  %v560_v46 = vld [vmem:[%s3602_s1] sm:$0xff]  ;;  %v1806_v48 = vld [vmem:[%s2455_s29 + $0x48] sm:$0xff] }
 0x18d   : > { %v1805_v47 = vld [vmem:[%s2455_s29 + $0x40] sm:$0xff] }
 0x18e   : > { %579 = vmatpush.msra.mxu0 %v572_v34  ;;  %2027 = vmatpush.msra.mxu1 %v572_v34  ;;  %v2163_v49 = vld [vmem:[%s3605_s4] ss:$0 sm:$0xff] }
 0x18f   : > { %v2164_v50 = vld [vmem:[%s3606_s5] ss:$0 sm:$0xff] }
 0x190   : > { %580 = vmatpush.msra.mxu0 %v571_v35  ;;  %2028 = vmatpush.msra.mxu1 %v571_v35 }
 0x192   : > { %581 = vmatpush.msra.mxu0 %v570_v36  ;;  %2029 = vmatpush.msra.mxu1 %v570_v36 }
 0x194   : > { %582 = vmatpush.msra.mxu0 %v569_v37  ;;  %2030 = vmatpush.msra.mxu1 %v569_v37 }
 0x196   : > { %583 = vmatpush.msra.mxu0 %v568_v38  ;;  %2031 = vmatpush.msra.mxu1 %v568_v38 }
 0x198   : > { %584 = vmatpush.msra.mxu0 %v567_v39  ;;  %2032 = vmatpush.msra.mxu1 %v567_v39 }
 0x19a   : > { %585 = vmatpush.msra.mxu0 %v566_v40  ;;  %2033 = vmatpush.msra.mxu1 %v566_v40 }
 0x19c   : > { %586 = vmatpush.msra.mxu0 %v565_v41  ;;  %2034 = vmatpush.msra.mxu1 %v565_v41 }
 0x19e   : > { %587 = vmatpush.msra.mxu0 %v564_v42  ;;  %2035 = vmatpush.msra.mxu1 %v564_v42 }
 0x1a0   : > { %588 = vmatpush.msra.mxu0 %v563_v43  ;;  %2036 = vmatpush.msra.mxu1 %v563_v43 }
 0x1a2   : > { %589 = vmatpush.msra.mxu0 %v562_v44  ;;  %2037 = vmatpush.msra.mxu1 %v562_v44 }
 0x1a4   : > { %590 = vmatpush.msra.mxu0 %v561_v45  ;;  %2038 = vmatpush.msra.mxu1 %v561_v45 }
 0x1a6   : > { %591 = vmatpush.msra.mxu0 %v560_v46  ;;  %2039 = vmatpush.msra.mxu1 %v560_v46 }
 0x1a7   : > { %592 = vmatmul.f32.vlgmr.msra.gmra.mxu0 %v1805_v47  ;;  %595 = vmatmul.f32.vlgmr.msra.gmra.mxu1 %v1806_v48 }
 0x224   : > { %v593_v51 = vpop.f32.mrf.mxu0  ;;  %v596_v52 = vpop.f32.mrf.mxu1 }
 0x225   : > { %v603_v53 = vmul.f32 %v2163_v49, %v593_v51  ;;  %v604_v54 = vmul.f32 %v2163_v49, %v596_v52 }
 0x227   : > { %v609_v55 = vadd.f32 %v2164_v50, %v603_v53  ;;  %v610_v56 = vadd.f32 %v2164_v50, %v604_v54 }
 0x229   : > { %v611_v57 = vmax.f32 %v609_v55, 0.0  ;;  %v612_v58 = vmax.f32 %v610_v56, 0.0 }
 0x22b   : > { %613 = vst [vmem:[#allocation2 + $0x20] sm:$0xff] %v611_v57 }
 0x22c   : > { %614 = vst [vmem:[#allocation2] sm:$0xff] %v612_v58 }
 0x22d PF: > { %p1807_p2 = scmp.ne.s32.totalorder %s2247_s16, 3 }
 0x22f   : > { %618 = sbr.rel (%p1807_p2) target bundleno = 567 (0x237), region = 76 }
 0x234   : > { %v2266_v59 = vmov 0.0  }
 0x235   : > { %619 = vst [vmem:[#allocation2 + $0x20] sm:$0xff] %v2266_v59 }
 0x236   : > { %620 = vst [vmem:[#allocation2] sm:$0xff] %v2266_v59 }
 0x237 PF: > { %v1823_v60 = vld [vmem:[%s3603_s2 + $0x1f8] sm:$0xff]  ;;  %v1822_v62 = vld [vmem:[%s3603_s2 + $0x1f0] sm:$0xff]  ;;  %v633_v63 = vlaneseq  ;;  %v1821_v1 = vld [vmem:[%s3603_s2 + $0x1e8] sm:$0xff]  ;;  %s1905_s12 = sshll.u32 %s2247_s16, 3  ;;  %s1906_s23 = sshll.u32 %s2251_s17, 5 }
 0x238   : > { %v1839_v61 = vld [vmem:[%s3603_s2 + $0x278] sm:$0xff]  ;;  %2040 = vmatpush.msra.mxu2 %v1823_v60  ;;  %v1838_v0 = vld [vmem:[%s3603_s2 + $0x270] sm:$0xff]  ;;  %v1837_v2 = vld [vmem:[%s3603_s2 + $0x268] sm:$0xff]  ;;  %1099 = vmatpush.msra.mxu0 %v1823_v60  ;;  %s1698_s21 = sadd.s32 %s1906_s23, %s1905_s12  ;;  %s1701_s16 = sshll.u32 %s2499_s18, 4  ;;  %s1702_s16 = int_to_ptr.vmem [resolvable:$true] %s1701_s16 }
 0x239   : > { %2056 = vmatpush.msra.mxu3 %v1839_v61  ;;  %1140 = vmatpush.msra.mxu1 %v1839_v61  ;;  %v2636_v3 = vshrl.u32 %v633_v63, 7  ;;  %v1820_v4 = vld [vmem:[%s3603_s2 + $0x1e0] sm:$0xff]  ;;  %v1819_v8 = vld [vmem:[%s3603_s2 + $0x1d8] sm:$0xff]  ;;  %v1818_v12 = vld [vmem:[%s3603_s2 + $0x1d0] sm:$0xff]  ;;  %s1907_s25 = sshll.u32 %s1698_s21, 3  ;;  %s3645_s19 = sand.u32 1, %s2239_s14  }
 0x23a   : > { %2041 = vmatpush.msra.mxu2 %v1822_v62  ;;  %v1836_v5 = vld [vmem:[%s3603_s2 + $0x260] sm:$0xff]  ;;  %1100 = vmatpush.msra.mxu0 %v1822_v62  ;;  %v1835_v9 = vld [vmem:[%s3603_s2 + $0x258] sm:$0xff]  ;;  %v1834_v13 = vld [vmem:[%s3603_s2 + $0x250] sm:$0xff]  ;;  %s1700_s0 = scalar_lea.hbm %s3611_s10, %s1907_s25  ;;  %s1687_s11 = scalar_lea.sflag [#allocation5], %s3645_s19 }
 0x23b   : > { %2057 = vmatpush.msra.mxu3 %v1838_v0  ;;  %1141 = vmatpush.msra.mxu1 %v1838_v0  ;;  %v2645_v6 = vadd.s32 48, %v2636_v3  ;;  %v2648_v7 = vadd.s32 16, %v2636_v3  ;;  %v1817_v14 = vld [vmem:[%s3603_s2 + $0x1c8] sm:$0xff]  ;;  %v2671_v24 = vadd.s32 64, %v2636_v3  ;;  %v1816_v25 = vld [vmem:[%s3603_s2 + $0x1c0] sm:$0xff]  ;;  %v1815_v27 = vld [vmem:[%s3603_s2 + $0x1b8] sm:$0xff] }
 0x23c   : > { %2042 = vmatpush.msra.mxu2 %v1821_v1  ;;  %1101 = vmatpush.msra.mxu0 %v1821_v1  ;;  %v1833_v15 = vld [vmem:[%s3603_s2 + $0x248] sm:$0xff]  ;;  %v1832_v26 = vld [vmem:[%s3603_s2 + $0x240] sm:$0xff]  ;;  %v1831_v28 = vld [vmem:[%s3603_s2 + $0x238] sm:$0xff]  ;;  %v2705_v36 = vadd.s32 32, %v2636_v3  ;;  %vm802_vm0 = vcmp.lt.s32.totalorder %v2636_v3, 1  ;;  %vm827_vm5 = vcmp.lt.s32.totalorder %v2636_v3, 7 }
 0x23d   : > { %2058 = vmatpush.msra.mxu3 %v1837_v2  ;;  %1142 = vmatpush.msra.mxu1 %v1837_v2  ;;  %v692_v10 = vand.u32 15, %v2645_v6  ;;  %v664_v11 = vand.u32 15, %v2648_v7  ;;  %v706_v29 = vand.u32 15, %v2671_v24  ;;  %v1814_v30 = vld [vmem:[%s3603_s2 + $0x1b0] sm:$0xff]  ;;  %v1813_v32 = vld [vmem:[%s3603_s2 + $0x1a8] sm:$0xff]  ;;  %v1812_v34 = vld [vmem:[%s3603_s2 + $0x1a0] sm:$0xff] }
 0x23e   : > { %2043 = vmatpush.msra.mxu2 %v1820_v4  ;;  %1102 = vmatpush.msra.mxu0 %v1820_v4  ;;  %v1830_v31 = vld [vmem:[%s3603_s2 + $0x230] sm:$0xff]  ;;  %v1829_v33 = vld [vmem:[%s3603_s2 + $0x228] sm:$0xff]  ;;  %v1828_v35 = vld [vmem:[%s3603_s2 + $0x220] sm:$0xff]  ;;  %v678_v41 = vand.u32 15, %v2705_v36  ;;  %s1703_s17 = sshll.u32 %s1700_s0, 4  ;;  %s2189_s12 = scalar_lea.hbm %s3611_s10, 512  ;;  %s1704_s17 = int_to_ptr.hbm [resolvable:$true] %s1703_s17 }
 0x23f   : > { %2059 = vmatpush.msra.mxu3 %v1836_v5  ;;  %1143 = vmatpush.msra.mxu1 %v1836_v5  ;;  %v1811_v37 = vld [vmem:[%s3603_s2 + $0x198] sm:$0xff]  ;;  %v2713_v39 = vld [vmem:[#allocation2 + $0x28] sm:$0xff]  ;;  %v2715_v40 = vld [vmem:[#allocation2 + $0x50] sm:$0xff]  ;;  %vm2751_vm1 = vcmp.ne.s32.totalorder %v692_v10, 0  ;;  %vm2785_vm2 = vcmp.ne.s32.totalorder %v664_v11, 0  ;;  %vm2880_vm3 = vcmp.ne.s32.totalorder %v706_v29, 0 }
 0x240   : > { %2044 = vmatpush.msra.mxu2 %v1819_v8  ;;  %1103 = vmatpush.msra.mxu0 %v1819_v8  ;;  %v1827_v38 = vld [vmem:[%s3603_s2 + $0x218] sm:$0xff]  ;;  %v1810_v42 = vld [vmem:[%s3603_s2 + $0x190] sm:$0xff]  ;;  %v1809_v44 = vld [vmem:[%s3603_s2 + $0x188] sm:$0xff]  ;;  %v795_v45 = vrot.slane %v2713_v39, 7  ;;  %v796_v46 = vrot.slane %v2715_v40, 7  ;;  %vm2948_vm4 = vcmp.ne.s32.totalorder %v678_v41, 0 }
 0x241   : > { %2060 = vmatpush.msra.mxu3 %v1835_v9  ;;  %1144 = vmatpush.msra.mxu1 %v1835_v9  ;;  %v1826_v43 = vld [vmem:[%s3603_s2 + $0x210] sm:$0xff]  ;;  %v1825_v47 = vld [vmem:[%s3603_s2 + $0x208] sm:$0xff]  ;;  %v2735_v49 = vld [vmem:[#allocation2 + $0x40] sm:$0xff]  ;;  %v2965_v41 = vadd.s32 40, %v2636_v3  ;;  %s2183_s24 = sshra.s32 %s1704_s17, 4  ;;  %s2184_s24 = int_to_ptr.hbm [resolvable:$true] %s2183_s24 }
 0x242   : > { %2045 = vmatpush.msra.mxu2 %v1818_v12  ;;  %1104 = vmatpush.msra.mxu0 %v1818_v12  ;;  %v2733_v48 = vld [vmem:[#allocation2 + $0x8] sm:$0xff]  ;;  %v1808_v50 = vld [vmem:[%s3603_s2 + $0x180] sm:$0xff]  ;;  %v2747_v52 = vsel %vm802_vm0, %v795_v45, %v796_v46  ;;  %v1855_v54 = vld [vmem:[%s3603_s2 + $0x2f8] sm:$0xff]  ;;  %v792_v56 = vrot.slane %v2735_v49, 7  ;;  %s2185_s29 = scalar_lea.hbm %s2184_s24, 64  ;;  %p2190_p7 = scmp.lt.s32.totalorder %s2184_s24, %s3611_s10 }
 0x243   : > { %2061 = vmatpush.msra.mxu3 %v1834_v13  ;;  %1145 = vmatpush.msra.mxu1 %v1834_v13  ;;  %v1824_v51 = vld [vmem:[%s3603_s2 + $0x200] sm:$0xff]  ;;  %v791_v55 = vrot.slane %v2733_v48, 7  ;;  %v1011_v57 = vld [vmem:[%s3603_s2 + $0x78] sm:$0xff]  ;;  %v2763_v58 = vld [vmem:[#allocation2 + $0x30] sm:$0xff]  ;;  %p2186_p4 = scmp.ne.s32.totalorder %s2184_s24, %s2185_s29  ;;  %p2191_p9 = scmp.lt.s32.totalorder %s2189_s12, %s2185_s29 }
 0x244   : > { %2046 = vmatpush.msra.mxu2 %v1817_v14  ;;  %1105 = vmatpush.msra.mxu0 %v1817_v14  ;;  %v1854_v59 = vld [vmem:[%s3603_s2 + $0x2f0] sm:$0xff]  ;;  %v797_v63 = vrot.slane %v2763_v58, 7  ;;  %v1853_v0 = vld [vmem:[%s3603_s2 + $0x2e8] sm:$0xff]  ;;  %v1027_v2 = vld [vmem:[%s3603_s2 + $0xf8] sm:$0xff] }
 0x245   : > { %2062 = vmatpush.msra.mxu3 %v1833_v15  ;;  %1146 = vmatpush.msra.mxu1 %v1833_v15  ;;  %v1010_v60 = vld [vmem:[%s3603_s2 + $0x70] sm:$0xff]  ;;  %v2781_v61 = vsel %vm802_vm0, %v791_v55, %v792_v56  ;;  %v1009_v1 = vld [vmem:[%s3603_s2 + $0x68] sm:$0xff]  ;;  %v1043_v4 = vld [vmem:[%s3603_s2 + $0x178] sm:$0xff]  ;;  %p2187_p5 = pnand %p2186_p4, %p2375_p3  ;;  %p2192_p10 = por %p2191_p9, %p2190_p7 }
 0x246   : > { %2047 = vmatpush.msra.mxu2 %v1816_v25  ;;  %1106 = vmatpush.msra.mxu0 %v1816_v25  ;;  %v1852_v5 = vld [vmem:[%s3603_s2 + $0x2e0] sm:$0xff]  ;;  %v2814_v7 = vsel %vm802_vm0, %v796_v46, %v797_v63  ;;  %v1851_v8 = vld [vmem:[%s3603_s2 + $0x2d8] sm:$0xff]  ;;  %v2822_v10 = vld [vmem:[#allocation2 + $0x10] sm:$0xff]  ;;  %v2841_v25 = vadd.s32 24, %v2636_v3 }
 0x247   : > { %2063 = vmatpush.msra.mxu3 %v1832_v26  ;;  %1147 = vmatpush.msra.mxu1 %v1832_v26  ;;  %v1008_v6 = vld [vmem:[%s3603_s2 + $0x60] sm:$0xff]  ;;  %v1007_v9 = vld [vmem:[%s3603_s2 + $0x58] sm:$0xff]  ;;  %v1026_v12 = vld [vmem:[%s3603_s2 + $0xf0] sm:$0xff]  ;;  %p2188_p6 = pneg %p2187_p5 }
 0x248   : > { %2048 = vmatpush.msra.mxu2 %v1815_v27  ;;  %1107 = vmatpush.msra.mxu0 %v1815_v27  ;;  %v2824_v11 = vld [vmem:[#allocation2 + $0x18] sm:$0xff]  ;;  %v1042_v13 = vld [vmem:[%s3603_s2 + $0x170] sm:$0xff]  ;;  %v1025_v26 = vld [vmem:[%s3603_s2 + $0xe8] sm:$0xff]  ;;  %v793_v27 = vrot.slane %v2822_v10, 7 }
 0x249   : > { %2064 = vmatpush.msra.mxu3 %v1831_v28  ;;  %1148 = vmatpush.msra.mxu1 %v1831_v28  ;;  %v1850_v14 = vld [vmem:[%s3603_s2 + $0x2d0] sm:$0xff]  ;;  %v798_v28 = vrot.slane %v2824_v11, 7  ;;  %v1003_v46 = vld [vmem:[%s3603_s2 + $0x38] sm:$0xff]  ;;  %p2193_p11 = pnand %p2192_p10, %p2188_p6 }
 0x24a   : > { %2049 = vmatpush.msra.mxu2 %v1814_v30  ;;  %1108 = vmatpush.msra.mxu0 %v1814_v30  ;;  %v1006_v15 = vld [vmem:[%s3603_s2 + $0x50] sm:$0xff]  ;;  %v1849_v30 = vld [vmem:[%s3603_s2 + $0x2c8] sm:$0xff]  ;;  %v1023_v24 = vld [vmem:[%s3603_s2 + $0xd8] sm:$0xff] }
 0x24b   : > { %2065 = vmatpush.msra.mxu3 %v1830_v31  ;;  %1149 = vmatpush.msra.mxu1 %v1830_v31  ;;  %v1005_v31 = vld [vmem:[%s3603_s2 + $0x48] sm:$0xff]  ;;  %v2893_v29 = vld [vmem:[#allocation2 + $0x58] sm:$0xff] }
 0x24c   : > { %2050 = vmatpush.msra.mxu2 %v1813_v32  ;;  %1109 = vmatpush.msra.mxu0 %v1813_v32  ;;  %v671_v32 = vand.u32 15, %v2841_v25  ;;  %v999_v36 = vld [vmem:[%s3603_s2 + $0x18] sm:$0xff] }
 0x24d   : > { %2066 = vmatpush.msra.mxu3 %v1829_v33  ;;  %1150 = vmatpush.msra.mxu1 %v1829_v33  ;;  %v1024_v33 = vld [vmem:[%s3603_s2 + $0xe0] sm:$0xff]  ;;  %v1903_v25 = vld [vmem:[%s3603_s2 + $0x478] sm:$0xff] }
 0x24e   : > { %2051 = vmatpush.msra.mxu2 %v1812_v34  ;;  %1110 = vmatpush.msra.mxu0 %v1812_v34  ;;  %v1041_v34 = vld [vmem:[%s3603_s2 + $0x168] sm:$0xff]  ;;  %vm3102_vm7 = vcmp.ne.s32.totalorder %v671_v32, 15  ;;  %v1879_v62 = vld [vmem:[%s3603_s2 + $0x3b8] sm:$0xff] }
 0x24f   : > { %2067 = vmatpush.msra.mxu3 %v1828_v35  ;;  %1151 = vmatpush.msra.mxu1 %v1828_v35  ;;  %v1848_v35 = vld [vmem:[%s3603_s2 + $0x2c0] sm:$0xff]  ;;  %v1029_v32 = vld [vmem:[%s3603_s2 + $0x108] sm:$0xff] }
 0x250   : > { %2052 = vmatpush.msra.mxu2 %v1811_v37  ;;  %1111 = vmatpush.msra.mxu0 %v1811_v37  ;;  %v1004_v37 = vld [vmem:[%s3603_s2 + $0x40] sm:$0xff] }
 0x251   : > { %2068 = vmatpush.msra.mxu3 %v1827_v38  ;;  %1152 = vmatpush.msra.mxu1 %v1827_v38  ;;  %v2872_v38 = vsel %vm802_vm0, %v792_v56, %v793_v27  ;;  %v1022_v56 = vld [vmem:[%s3603_s2 + $0xd0] sm:$0xff] }
 0x252   : > { %2053 = vmatpush.msra.mxu2 %v1810_v42  ;;  %1112 = vmatpush.msra.mxu0 %v1810_v42  ;;  %v2876_v42 = vsel %vm802_vm0, %v797_v63, %v798_v28 }
 0x253   : > { %2069 = vmatpush.msra.mxu3 %v1826_v43  ;;  %1153 = vmatpush.msra.mxu1 %v1826_v43 }
 0x254   : > { %2054 = vmatpush.msra.mxu2 %v1809_v44  ;;  %1113 = vmatpush.msra.mxu0 %v1809_v44  ;;  %v1847_v44 = vld [vmem:[%s3603_s2 + $0x2b8] sm:$0xff] }
 0x255   : > { %2070 = vmatpush.msra.mxu3 %v1825_v47  ;;  %1154 = vmatpush.msra.mxu1 %v1825_v47  ;;  %v2895_v47 = vld [vmem:[#allocation2 + $0x48] sm:$0xff] }
 0x256   : > { %2055 = vmatpush.msra.mxu2 %v1808_v50  ;;  %1114 = vmatpush.msra.mxu0 %v1808_v50  ;;  %v1846_v50 = vld [vmem:[%s3603_s2 + $0x2b0] sm:$0xff]  ;;  %v799_v63 = vrot.slane %v2895_v47, 7 }
 0x257   : > { %2071 = vmatpush.msra.mxu3 %v1824_v51  ;;  %1917 = vmatmul.msk.f32.vlgmr.msra.gmra.mxu2 %vm2751_vm1, %v2747_v52 }
 0x258   : > { %1168 = vmatmul.f32.vlgmr.msra.gmra.mxu3 %v2715_v40  ;;  %1181 = vmatpush.msrb.mxu2 %v1855_v54  ;;  %v1002_v54 = vld [vmem:[%s3603_s2 + $0x30] sm:$0xff] }
 0x259   : > { %1222 = vmatpush.msrb.mxu3 %v1011_v57  ;;  %1155 = vmatpush.msra.mxu1 %v1824_v51  ;;  %v1040_v51 = vld [vmem:[%s3603_s2 + $0x160] sm:$0xff]  ;;  %v1845_v57 = vld [vmem:[%s3603_s2 + $0x2a8] sm:$0xff] }
 0x25a   : > { %1182 = vmatpush.msrb.mxu2 %v1854_v59  ;;  %1913 = vmatmul.msk.f32.vlgmr.msra.gmra.mxu0 %vm2785_vm2, %v2781_v61  ;;  %v1039_v59 = vld [vmem:[%s3603_s2 + $0x158] sm:$0xff] }
 0x25b   : > { %1223 = vmatpush.msrb.mxu3 %v1010_v60  ;;  %1156 = vmatmul.f32.vlgmr.msra.gmra.mxu1 %v2735_v49  ;;  %v794_v60 = vrot.slane %v2893_v29, 7 }
 0x25c   : > { %1183 = vmatpush.msrb.mxu2 %v1853_v0  ;;  %1263 = vmatpush.msrb.mxu0 %v1027_v2  ;;  %v1001_v0 = vld [vmem:[%s3603_s2 + $0x28] sm:$0xff]  ;;  %v1844_v2 = vld [vmem:[%s3603_s2 + $0x2a0] sm:$0xff] }
 0x25d   : > { %1224 = vmatpush.msrb.mxu3 %v1009_v1  ;;  %1304 = vmatpush.msrb.mxu1 %v1043_v4  ;;  %v1021_v1 = vld [vmem:[%s3603_s2 + $0xc8] sm:$0xff]  ;;  %v1038_v4 = vld [vmem:[%s3603_s2 + $0x150] sm:$0xff] }
 0x25e   : > { %1184 = vmatpush.msrb.mxu2 %v1852_v5  ;;  %1264 = vmatpush.msrb.mxu0 %v1026_v12  ;;  %v1000_v5 = vld [vmem:[%s3603_s2 + $0x20] sm:$0xff]  ;;  %v2956_v12 = vsel %vm802_vm0, %v798_v28, %v799_v63  ;;  %v2985_v28 = vld [vmem:[#allocation2 + $0x38] sm:$0xff] }
 0x25f   : > { %1225 = vmatpush.msrb.mxu3 %v1008_v6  ;;  %1130 = vmatmul.f32.gmra.mxu2 %v2814_v7  ;;  %v1020_v6 = vld [vmem:[%s3603_s2 + $0xc0] sm:$0xff] }
 0x260   : > { %1171 = vmatmul.f32.gmra.mxu3 %v2763_v58  ;;  %1185 = vmatpush.msrb.mxu2 %v1851_v8  ;;  %v2944_v8 = vsel %vm802_vm0, %v793_v27, %v794_v60  ;;  %v998_v27 = vld [vmem:[%s3603_s2 + $0x10] sm:$0xff] }
 0x261   : > { %1226 = vmatpush.msrb.mxu3 %v1007_v9  ;;  %1305 = vmatpush.msrb.mxu1 %v1042_v13  ;;  %v1843_v13 = vld [vmem:[%s3603_s2 + $0x298] sm:$0xff] }
 0x262   : > { %1186 = vmatpush.msrb.mxu2 %v1850_v14  ;;  %1265 = vmatpush.msrb.mxu0 %v1025_v26  ;;  %v1019_v14 = vld [vmem:[%s3603_s2 + $0xb8] sm:$0xff]  ;;  %v1842_v26 = vld [vmem:[%s3603_s2 + $0x290] sm:$0xff] }
 0x263   : > { %1227 = vmatpush.msrb.mxu3 %v1006_v15  ;;  %1159 = vmatmul.f32.gmra.mxu1 %v2822_v10  ;;  %v1037_v15 = vld [vmem:[%s3603_s2 + $0x148] sm:$0xff] }
 0x264   : > { %1187 = vmatpush.msrb.mxu2 %v1849_v30  ;;  %1266 = vmatpush.msrb.mxu0 %v1024_v33  ;;  %v2987_v30 = vld [vmem:[#allocation2] sm:$0xff]  ;;  %v1018_v33 = vld [vmem:[%s3603_s2 + $0xb0] sm:$0xff] }
 0x265   : > { %1228 = vmatpush.msrb.mxu3 %v1005_v31  ;;  %1306 = vmatpush.msrb.mxu1 %v1041_v34  ;;  %v685_v31 = vand.u32 15, %v2965_v41  ;;  %v1036_v34 = vld [vmem:[%s3603_s2 + $0x140] sm:$0xff] }
 0x266   : > { %1188 = vmatpush.msrb.mxu2 %v1848_v35  ;;  %1118 = vmatmul.f32.gmra.mxu0 %v2872_v38  ;;  %v1841_v35 = vld [vmem:[%s3603_s2 + $0x288] sm:$0xff]  ;;  %v1896_v41 = vld [vmem:[%s3603_s2 + $0x440] sm:$0xff] }
 0x267   : > { %1229 = vmatpush.msrb.mxu3 %v1004_v37  ;;  %1919 = vmatmul.msk.f32.gmra.mxu2 %vm2880_vm3, %v2876_v42  ;;  %v997_v37 = vld [vmem:[%s3603_s2 + $0x8] sm:$0xff]  ;;  %vm3206_vm9 = vcmp.ne.s32.totalorder %v685_v31, 15 }
 0x268   : > { %1174 = vmatmul.f32.gmra.mxu3 %v2824_v11  ;;  %1189 = vmatpush.msrb.mxu2 %v1847_v44  ;;  %v817_v44 = vrot.slane %v2735_v49, 1  ;;  %v1877_v31 = vld [vmem:[%s3603_s2 + $0x3a8] sm:$0xff] }
 0x269   : > { %1230 = vmatpush.msrb.mxu3 %v1003_v46  ;;  %1267 = vmatpush.msrb.mxu0 %v1023_v24  ;;  %v1017_v46 = vld [vmem:[%s3603_s2 + $0xa8] sm:$0xff]  ;;  %v1035_v24 = vld [vmem:[%s3603_s2 + $0x138] sm:$0xff] }
 0x26a   : > { %1190 = vmatpush.msrb.mxu2 %v1846_v50  ;;  %1307 = vmatpush.msrb.mxu1 %v1040_v51  ;;  %v818_v50 = vrot.slane %v2822_v10, 1  ;;  %v650_v51 = vand.u32 15, %v2636_v3 }
 0x26b   : > { %1231 = vmatpush.msrb.mxu3 %v1002_v54  ;;  %1268 = vmatpush.msrb.mxu0 %v1022_v56  ;;  %v790_v54 = vrot.slane %v2985_v28, 7  ;;  %v801_v56 = vrot.slane %v2987_v30, 7 }
 0x26c   : > { %1191 = vmatpush.msrb.mxu2 %v1845_v57  ;;  %1308 = vmatpush.msrb.mxu1 %v1039_v59  ;;  %v1840_v57 = vld [vmem:[%s3603_s2 + $0x280] sm:$0xff]  ;;  %vm2072_vm6 = vcmp.ne.s32.totalorder %v650_v51, 0  ;;  %v3091_v51 = vadd.s32 56, %v2636_v3 }
 0x26d   : > { %1232 = vmatpush.msrb.mxu3 %v1001_v0  ;;  %1269 = vmatpush.msrb.mxu0 %v1021_v1  ;;  %v996_v59 = vld [vmem:[%s3603_s2] sm:$0xff]  ;;  %v1034_v1 = vld [vmem:[%s3603_s2 + $0x130] sm:$0xff] }
 0x26e   : > { %1192 = vmatpush.msrb.mxu2 %v1844_v2  ;;  %1309 = vmatpush.msrb.mxu1 %v1038_v4  ;;  %v1016_v0 = vld [vmem:[%s3603_s2 + $0xa0] sm:$0xff]  ;;  %v3032_v2 = vsel %vm802_vm0, %v794_v60, %v795_v45  ;;  %v3038_v4 = vsel %vm827_vm5, %v817_v44, %v818_v50  ;;  %v1015_v45 = vld [vmem:[%s3603_s2 + $0x98] sm:$0xff] }
 0x26f   : > { %1233 = vmatpush.msrb.mxu3 %v1000_v5  ;;  %1270 = vmatpush.msrb.mxu0 %v1020_v6  ;;  %v814_v5 = vsel %vm802_vm0, %v801_v56, %v790_v54  ;;  %v1871_v60 = vld [vmem:[%s3603_s2 + $0x378] sm:$0xff] }
 0x270   : > { %1915 = vmatmul.msk.f32.gmra.mxu0 %vm2948_vm4, %v2944_v8  ;;  %1136 = vmatmul.f32.gmra.mxu2 %v2956_v12  ;;  %v1887_v6 = vld [vmem:[%s3603_s2 + $0x3f8] sm:$0xff] }
 0x271   : > { %1162 = vmatmul.f32.gmra.mxu1 %v2893_v29  ;;  %1177 = vmatmul.f32.gmra.mxu3 %v2895_v47 }
 0x272   : > { %1193 = vmatpush.msrb.mxu2 %v1843_v13  ;;  %1234 = vmatpush.msrb.mxu3 %v999_v36  ;;  %v1033_v13 = vld [vmem:[%s3603_s2 + $0x128] sm:$0xff]  ;;  %v1014_v36 = vld [vmem:[%s3603_s2 + $0x90] sm:$0xff] }
 0x273   : > { %1271 = vmatpush.msrb.mxu0 %v1019_v14  ;;  %1310 = vmatpush.msrb.mxu1 %v1037_v15  ;;  %v1870_v14 = vld [vmem:[%s3603_s2 + $0x370] sm:$0xff]  ;;  %v1032_v15 = vld [vmem:[%s3603_s2 + $0x120] sm:$0xff] }
 0x274   : > { %1194 = vmatpush.msrb.mxu2 %v1842_v26  ;;  %1235 = vmatpush.msrb.mxu3 %v998_v27  ;;  %v1886_v26 = vld [vmem:[%s3603_s2 + $0x3f0] sm:$0xff]  ;;  %v819_v27 = vrot.slane %v2893_v29, 1 }
 0x275   : > { %1272 = vmatpush.msrb.mxu0 %v1018_v33  ;;  %1311 = vmatpush.msrb.mxu1 %v1036_v34  ;;  %v1013_v33 = vld [vmem:[%s3603_s2 + $0x88] sm:$0xff] }
 0x276   : > { %1195 = vmatpush.msrb.mxu2 %v1841_v35  ;;  %1236 = vmatpush.msrb.mxu3 %v997_v37  ;;  %v1869_v34 = vld [vmem:[%s3603_s2 + $0x368] sm:$0xff]  ;;  %v1031_v35 = vld [vmem:[%s3603_s2 + $0x118] sm:$0xff] }
 0x277   : > { %1273 = vmatpush.msrb.mxu0 %v1017_v46  ;;  %1312 = vmatpush.msrb.mxu1 %v1035_v24  ;;  %v1885_v37 = vld [vmem:[%s3603_s2 + $0x3e8] sm:$0xff]  ;;  %v1012_v46 = vld [vmem:[%s3603_s2 + $0x80] sm:$0xff] }
 0x278   : > { %1196 = vmatpush.msrb.mxu2 %v1840_v57  ;;  %1237 = vmatpush.msrb.mxu3 %v996_v59  ;;  %v1868_v24 = vld [vmem:[%s3603_s2 + $0x360] sm:$0xff]  ;;  %v1030_v57 = vld [vmem:[%s3603_s2 + $0x110] sm:$0xff]  ;;  %v3098_v59 = vsel %vm827_vm5, %v818_v50, %v819_v27  ;;  %v699_v50 = vand.u32 15, %v3091_v51  ;;  %v824_v51 = vrot.slane %v2895_v47, 1 }
 0x279   : > { %1274 = vmatpush.msrb.mxu0 %v1016_v0  ;;  %1313 = vmatpush.msrb.mxu1 %v1034_v1  ;;  %v813_v1 = vsel %vm802_vm0, %v790_v54, %v791_v55  ;;  %v1884_v55 = vld [vmem:[%s3603_s2 + $0x3e0] sm:$0xff]  ;;  %v1867_v54 = vld [vmem:[%s3603_s2 + $0x358] sm:$0xff] }
 0x27a   : > { %1124 = vmatmul.f32.gmra.mxu0 %v3032_v2  ;;  %1165 = vmatmul.f32.gmra.mxu1 %v2713_v39  ;;  %vm3295_vm10 = vcmp.ne.s32.totalorder %v699_v50, 15  ;;  %v1888_v0 = vld [vmem:[%s3603_s2 + $0x400] sm:$0xff] }
 0x27b   : > { %1197 = vmatmul.f32.vlgmr.msrb.gmra.mxu2 %v3038_v4  ;;  %1929 = vmatmul.msk.f32.vlgmr.msrb.gmra.mxu3 %vm2072_vm6, %v814_v5  ;;  %v815_v5 = vrot.slane %v2985_v28, 1 }
 0x27c   : > { %1275 = vmatpush.msrb.mxu0 %v1015_v45  ;;  %1418 = vmatpush.msra.mxu2 %v1871_v60  ;;  %v816_v45 = vrot.slane %v2733_v48, 1  ;;  %v1028_v60 = vld [vmem:[%s3603_s2 + $0x100] sm:$0xff] }
 0x27d   : > { %1459 = vmatpush.msra.mxu3 %v1887_v6  ;;  %1314 = vmatpush.msrb.mxu1 %v1033_v13  ;;  %v1902_v6 = vld [vmem:[%s3603_s2 + $0x470] sm:$0xff]  ;;  %v820_v13 = vrot.slane %v2713_v39, 1 }
 0x27e   : > { %1276 = vmatpush.msrb.mxu0 %v1014_v36  ;;  %1419 = vmatpush.msra.mxu2 %v1870_v14  ;;  %v838_v36 = vsel %vm827_vm5, %v815_v5, %v816_v45  ;;  %v1883_v14 = vld [vmem:[%s3603_s2 + $0x3d8] sm:$0xff] }
 0x27f   : > { %1315 = vmatpush.msrb.mxu1 %v1032_v15  ;;  %1460 = vmatpush.msra.mxu3 %v1886_v26  ;;  %v635_v15 = vadd.s32 8, %v2636_v3  ;;  %v1901_v26 = vld [vmem:[%s3603_s2 + $0x468] sm:$0xff] }
 0x280   : > { %1277 = vmatpush.msrb.mxu0 %v1013_v33  ;;  %1420 = vmatpush.msra.mxu2 %v1869_v34  ;;  %v1866_v33 = vld [vmem:[%s3603_s2 + $0x350] sm:$0xff] }
 0x281   : > { %1316 = vmatpush.msrb.mxu1 %v1031_v35  ;;  %1461 = vmatpush.msra.mxu3 %v1885_v37  ;;  %v1882_v34 = vld [vmem:[%s3603_s2 + $0x3d0] sm:$0xff]  ;;  %v3155_v35 = vsel %vm827_vm5, %v819_v27, %v820_v13  ;;  %v1900_v37 = vld [vmem:[%s3603_s2 + $0x460] sm:$0xff]  ;;  %v1899_v27 = vld [vmem:[%s3603_s2 + $0x458] sm:$0xff] }
 0x282   : > { %1278 = vmatpush.msrb.mxu0 %v1012_v46  ;;  %1421 = vmatpush.msra.mxu2 %v1868_v24  ;;  %v657_v46 = vand.u32 15, %v635_v15  ;;  %v1865_v24 = vld [vmem:[%s3603_s2 + $0x348] sm:$0xff] }
 0x283   : > { %1317 = vmatpush.msrb.mxu1 %v1030_v57  ;;  %1921 = vmatmul.msk.f32.gmra.mxu2 %vm3102_vm7, %v3098_v59  ;;  %v1881_v57 = vld [vmem:[%s3603_s2 + $0x3c8] sm:$0xff] }
 0x284   : > { %1241 = vmatmul.f32.gmra.mxu3 %v813_v1  ;;  %1279 = vmatmul.f32.vlgmr.msrb.gmra.mxu0 %v2985_v28  ;;  %v821_v1 = vrot.slane %v2715_v40, 1  ;;  %vm2073_vm8 = vcmp.ne.s32.totalorder %v657_v46, 15  ;;  %v1861_v15 = vld [vmem:[%s3603_s2 + $0x328] sm:$0xff] }
 0x285   : > { %1500 = vmatpush.msra.mxu0 %v1903_v25  ;;  %1318 = vmatpush.msrb.mxu1 %v1029_v32  ;;  %v1864_v25 = vld [vmem:[%s3603_s2 + $0x340] sm:$0xff]  ;;  %v1893_v46 = vld [vmem:[%s3603_s2 + $0x428] sm:$0xff] }
 0x286   : > { %1462 = vmatpush.msra.mxu3 %v1884_v55  ;;  %1422 = vmatpush.msra.mxu2 %v1867_v54  ;;  %v1880_v32 = vld [vmem:[%s3603_s2 + $0x3c0] sm:$0xff]  ;;  %v837_v55 = vsel %vm827_vm5, %v816_v45, %v817_v44  ;;  %v1897_v44 = vld [vmem:[%s3603_s2 + $0x448] sm:$0xff]  ;;  %v3198_v45 = vadd.s32 72, %v2636_v3  ;;  %v3202_v54 = vsel %vm827_vm5, %v820_v13, %v821_v1  ;;  %v1862_v13 = vld [vmem:[%s3603_s2 + $0x330] sm:$0xff] }
 0x287   : > { %1319 = vmatpush.msrb.mxu1 %v1028_v60  ;;  %1501 = vmatpush.msra.mxu0 %v1902_v6  ;;  %v1878_v6 = vld [vmem:[%s3603_s2 + $0x3b0] sm:$0xff]  ;;  %v1590_v28 = vld [vmem:[%s3604_s3 + $0x48] sm:$0xff] }
 0x288   : > { %1320 = vmatmul.f32.vlgmr.msrb.gmra.mxu1 %v838_v36  ;;  %1463 = vmatpush.msra.mxu3 %v1883_v14  ;;  %v713_v36 = vand.u32 15, %v3198_v45  ;;  %v822_v14 = vrot.slane %v2763_v58, 1 }
 0x289   : > { %1502 = vmatpush.msra.mxu0 %v1901_v26  ;;  %1423 = vmatpush.msra.mxu2 %v1866_v33  ;;  %v1895_v26 = vld [vmem:[%s3603_s2 + $0x438] sm:$0xff]  ;;  %v1876_v33 = vld [vmem:[%s3603_s2 + $0x3a0] sm:$0xff] }
 0x28a   : > { %1464 = vmatpush.msra.mxu3 %v1882_v34  ;;  %v1875_v34 = vld [vmem:[%s3603_s2 + $0x398] sm:$0xff]  ;;  %vm3327_vm11 = vcmp.ne.s32.totalorder %v713_v36, 15  ;;  %v645_v36 = vadd.s32 88, %v2636_v3 }
 0x28b   : > { %1203 = vmatmul.f32.gmra.mxu2 %v3155_v35  ;;  %1503 = vmatpush.msra.mxu0 %v1900_v37  ;;  %v3250_v37 = vsel %vm827_vm5, %v821_v1, %v822_v14  ;;  %v1858_v1 = vld [vmem:[%s3603_s2 + $0x310] sm:$0xff] }
 0x28c   : > { %1931 = vmatmul.msk.f32.gmra.mxu3 %vm2785_vm2, %v2781_v61  ;;  %1282 = vmatmul.f32.gmra.mxu0 %v2733_v48  ;;  %v1898_v48 = vld [vmem:[%s3603_s2 + $0x450] sm:$0xff]  ;;  %v1863_v61 = vld [vmem:[%s3603_s2 + $0x338] sm:$0xff] }
 0x28d   : > { %1424 = vmatpush.msra.mxu2 %v1865_v24  ;;  %1465 = vmatpush.msra.mxu3 %v1881_v57  ;;  %v1859_v24 = vld [vmem:[%s3603_s2 + $0x318] sm:$0xff]  ;;  %v1892_v57 = vld [vmem:[%s3603_s2 + $0x420] sm:$0xff] }
 0x28e   : > { %1504 = vmatpush.msra.mxu0 %v1899_v27  ;;  %v823_v27 = vrot.slane %v2824_v11, 1 }
 0x28f   : > { %1425 = vmatpush.msra.mxu2 %v1864_v25  ;;  %1466 = vmatpush.msra.mxu3 %v1880_v32  ;;  %v1873_v25 = vld [vmem:[%s3603_s2 + $0x388] sm:$0xff]  ;;  %v1891_v32 = vld [vmem:[%s3603_s2 + $0x418] sm:$0xff] }
 0x290   : > { %1937 = vmatmul.msk.f32.gmra.mxu1 %vm2073_vm8, %v837_v55  ;;  %1505 = vmatpush.msra.mxu0 %v1898_v48  ;;  %v1872_v55 = vld [vmem:[%s3603_s2 + $0x380] sm:$0xff]  ;;  %v1890_v48 = vld [vmem:[%s3603_s2 + $0x410] sm:$0xff]  ;;  %v830_v50 = vsel %vm827_vm5, %v823_v27, %v824_v51 }
 0x291   : > { %1426 = vmatpush.msra.mxu2 %v1863_v61  ;;  %1467 = vmatpush.msra.mxu3 %v1879_v62  ;;  %v831_v61 = vsel %vm827_vm5, %v822_v14, %v823_v27  ;;  %v1595_v14 = vld [vmem:[%s3604_s3 + $0x70] sm:$0xff]  ;;  %v1586_v62 = vld [vmem:[%s3604_s3 + $0x28] sm:$0xff] }
 0x292   : > { %1506 = vmatpush.msra.mxu0 %v1897_v44  ;;  %v1856_v44 = vld [vmem:[%s3603_s2 + $0x300] sm:$0xff] }
 0x293   : > { %1923 = vmatmul.msk.f32.gmra.mxu2 %vm3206_vm9, %v3202_v54  ;;  %1468 = vmatpush.msra.mxu3 %v1878_v6  ;;  %v631_v6 = vld [vmem:[#allocation2 + $0x20] sm:$0xff] }
 0x294   : > { %1247 = vmatmul.f32.gmra.mxu3 %v2872_v38  ;;  %1285 = vmatmul.f32.gmra.mxu0 %v2735_v49  ;;  %v1860_v49 = vld [vmem:[%s3603_s2 + $0x320] sm:$0xff]  ;;  %v1894_v38 = vld [vmem:[%s3603_s2 + $0x430] sm:$0xff]  ;;  %v800_v9 = vrot.slane %v631_v6, 7 }
 0x295   : > { %1427 = vmatpush.msra.mxu2 %v1862_v13  ;;  %1507 = vmatpush.msra.mxu0 %v1896_v41  ;;  %v825_v13 = vrot.slane %v631_v6, 1 }
 0x296   : > { %1469 = vmatpush.msra.mxu3 %v1877_v31 }
 0x297   : > { %1428 = vmatpush.msra.mxu2 %v1861_v15  ;;  %1508 = vmatpush.msra.mxu0 %v1895_v26  ;;  %v829_v41 = vsel %vm827_vm5, %v824_v51, %v825_v13  ;;  %v1594_v26 = vld [vmem:[%s3604_s3 + $0x68] sm:$0xff] }
 0x298   : > { %1326 = vmatmul.f32.gmra.mxu1 %v3038_v4  ;;  %1470 = vmatpush.msra.mxu3 %v1876_v33  ;;  %v1874_v4 = vld [vmem:[%s3603_s2 + $0x390] sm:$0xff] }
 0x299   : > { %1429 = vmatpush.msra.mxu2 %v1860_v49  ;;  %1509 = vmatpush.msra.mxu0 %v1894_v38  ;;  %v727_v49 = vand.u32 15, %v645_v36 }
 0x29a   : > { %1471 = vmatpush.msra.mxu3 %v1875_v34 }
 0x29b   : > { %1209 = vmatmul.f32.gmra.mxu2 %v3250_v37  ;;  %1510 = vmatpush.msra.mxu0 %v1893_v46  ;;  %vm2075_vm13 = vcmp.ne.s32.totalorder %v727_v49, 15 }
 0x29c   : > { %1933 = vmatmul.msk.f32.gmra.mxu3 %vm2948_vm4, %v2944_v8  ;;  %1288 = vmatmul.f32.gmra.mxu0 %v2822_v10  ;;  %v1857_v10 = vld [vmem:[%s3603_s2 + $0x308] sm:$0xff] }
 0x29d   : > { %1430 = vmatpush.msra.mxu2 %v1859_v24  ;;  %1472 = vmatpush.msra.mxu3 %v1874_v4 }
 0x29e   : > { %1511 = vmatpush.msra.mxu0 %v1892_v57 }
 0x29f   : > { %1431 = vmatpush.msra.mxu2 %v1858_v1  ;;  %1473 = vmatpush.msra.mxu3 %v1873_v25  ;;  %v1589_v1 = vld [vmem:[%s3604_s3 + $0x40] sm:$0xff] }
 0x2a0   : > { %1939 = vmatmul.msk.f32.gmra.mxu1 %vm3102_vm7, %v3098_v59  ;;  %1512 = vmatpush.msra.mxu0 %v1891_v32  ;;  %v1889_v59 = vld [vmem:[%s3603_s2 + $0x408] sm:$0xff]  ;;  %v1588_v32 = vld [vmem:[%s3604_s3 + $0x38] sm:$0xff] }
 0x2a1   : > { %1432 = vmatpush.msra.mxu2 %v1857_v10  ;;  %1474 = vmatpush.msra.mxu3 %v1872_v55 }
 0x2a2   : > { %1513 = vmatpush.msra.mxu0 %v1890_v48 }
 0x2a3   : > { %1925 = vmatmul.msk.f32.gmra.mxu2 %vm3295_vm10, %v831_v61 }
 0x2a4   : > { %1253 = vmatmul.f32.gmra.mxu3 %v3032_v2  ;;  %1291 = vmatmul.f32.gmra.mxu0 %v2893_v29 }
 0x2a5   : > { %1433 = vmatpush.msra.mxu2 %v1856_v44  ;;  %1514 = vmatpush.msra.mxu0 %v1889_v59 }
 0x2a7   : > { %1515 = vmatpush.msra.mxu0 %v1888_v0 }
 0x2a8   : > { %1332 = vmatmul.f32.gmra.mxu1 %v3155_v35 }
 0x2ab   : > { %1215 = vmatmul.f32.gmra.mxu2 %v830_v50 }
 0x2ac   : > { %1935 = vmatmul.msk.f32.gmra.mxu3 %vm2751_vm1, %v2747_v52  ;;  %1294 = vmatmul.f32.gmra.mxu0 %v2713_v39 }
 0x2b0   : > { %1941 = vmatmul.msk.f32.gmra.mxu1 %vm3206_vm9, %v3202_v54 }
 0x2b3   : > { %1927 = vmatmul.msk.f32.gmra.mxu2 %vm3327_vm11, %v829_v41 }
 0x2b4   : > { %1259 = vmatmul.f32.gmra.mxu3 %v2814_v7  ;;  %1297 = vmatmul.f32.gmra.mxu0 %v2715_v40 }
 0x2b8   : > { %1338 = vmatmul.f32.gmra.mxu1 %v3250_v37 }
 0x2bb   : > { %1945 = vmatmul.msk.f32.vlgmr.msra.gmra.mxu2 %vm2948_vm4, %v2944_v8 }
 0x2bc   : > { %1300 = vmatmul.f32.gmra.mxu0 %v2763_v58  ;;  %1475 = vmatmul.f32.vlgmr.msra.gmra.mxu3 %v2893_v29 }
 0x2c0   : > { %1943 = vmatmul.msk.f32.gmra.mxu1 %vm3295_vm10, %v831_v61 }
 0x2c3   : > { %1437 = vmatmul.f32.gmra.mxu2 %v3032_v2 }
 0x2c4   : > { %1478 = vmatmul.f32.gmra.mxu3 %v2713_v39  ;;  %1516 = vmatmul.f32.vlgmr.msra.gmra.mxu0 %v3155_v35 }
 0x2cb   : > { %1947 = vmatmul.msk.f32.gmra.mxu2 %vm2751_vm1, %v2747_v52 }
 0x2cc   : > { %1481 = vmatmul.f32.gmra.mxu3 %v2715_v40  ;;  %1953 = vmatmul.msk.f32.gmra.mxu0 %vm3206_vm9, %v3202_v54  ;;  %v644_v40 = vadd.s32 80, %v2636_v3  ;;  %v1591_v3 = vld [vmem:[%s3604_s3 + $0x50] sm:$0xff] }
 0x2d3   : > { %1443 = vmatmul.f32.gmra.mxu2 %v2814_v7 }
 0x2d4   : > { %1484 = vmatmul.f32.gmra.mxu3 %v2763_v58  ;;  %1522 = vmatmul.f32.gmra.mxu0 %v3250_v37  ;;  %v1593_v37 = vld [vmem:[%s3604_s3 + $0x60] sm:$0xff] }
 0x2d7   : > { %v3356_v29 = vpop.f32.mrf.mxu0 }
 0x2d8   : > { %v1157_v25 = vpop.f32.mrf.mxu1 }
 0x2da   : > { %v1128_v39 = vpop.f32.mrf.mxu2 }
 0x2db   : > { %v1169_v8 = vpop.f32.mrf.mxu3  ;;  %1949 = vmatmul.msk.f32.gmra.mxu2 %vm2880_vm3, %v2876_v42  ;;  %v720_v42 = vand.u32 15, %v644_v40 }
 0x2dc   : > { %v3361_v52 = vadd.f32 %v1169_v8, %v1128_v39  ;;  %1487 = vmatmul.f32.gmra.mxu3 %v2824_v11  ;;  %1955 = vmatmul.msk.f32.gmra.mxu0 %vm3295_vm10, %v831_v61  ;;  %v804_v11 = vsel %vm802_vm0, %v799_v63, %v800_v9  ;;  %v803_v63 = vsel %vm802_vm0, %v800_v9, %v801_v56  ;;  %v1587_v61 = vld [vmem:[%s3604_s3 + $0x30] sm:$0xff] }
 0x2dd   : > { %vm2074_vm12 = vcmp.ne.s32.totalorder %v720_v42, 0  ;;  %v1583_v39 = vld [vmem:[%s3604_s3 + $0x10] sm:$0xff] }
 0x2e0   : > { %v1160_v44 = vpop.f32.mrf.mxu1 }
 0x2e2   : > { %v1131_v53 = vpop.f32.mrf.mxu2 }
 0x2e3   : > { %v1172_v58 = vpop.f32.mrf.mxu3  ;;  %1449 = vmatmul.f32.gmra.mxu2 %v2956_v12  ;;  %v3371_v43 = vpop.f32.mrf.mxu0  ;;  %v1596_v12 = vld [vmem:[%s3604_s3 + $0x78] sm:$0xff] }
 0x2e4   : > { %v3368_v7 = vadd.f32 %v1172_v58, %v1131_v53  ;;  %1490 = vmatmul.f32.gmra.mxu3 %v2895_v47  ;;  %1528 = vmatmul.f32.gmra.mxu0 %v830_v50  ;;  %v826_v47 = vrot.slane %v2987_v30, 1  ;;  %v1585_v50 = vld [vmem:[%s3604_s3 + $0x20] sm:$0xff]  ;;  %v1582_v58 = vld [vmem:[%s3604_s3 + $0x8] sm:$0xff]  ;;  %v1161_v49 = vadd.f32 %v1160_v44, %v3371_v43 }
 0x2e5   : > { %1597 = vmatpush.msra.mxu1 %v1596_v12  ;;  %v3493_v43 = vld [vmem:[%s3608_s7] ss:$0 sm:$0xff] }
 0x2e6   : > { %v828_v60 = vsel %vm827_vm5, %v825_v13, %v826_v47  ;;  %v839_v34 = vsel %vm827_vm5, %v826_v47, %v815_v5 }
 0x2e7   : > { %1598 = vmatpush.msra.mxu1 %v1595_v14 }
 0x2e9   : > { %1599 = vmatpush.msra.mxu1 %v1594_v26 }
 0x2ea   : > { %v1134_v2 = vpop.f32.mrf.mxu2 }
 0x2eb   : > { %1951 = vmatmul.msk.f32.gmra.mxu2 %vm2074_vm12, %v804_v11  ;;  %v1175_v35 = vpop.f32.mrf.mxu3  ;;  %1600 = vmatpush.msra.mxu1 %v1593_v37  ;;  %v1581_v11 = vld [vmem:[%s3604_s3] sm:$0xff] }
 0x2ec   : > { %1493 = vmatmul.f32.gmra.mxu3 %v631_v6  ;;  %1957 = vmatmul.msk.f32.gmra.mxu0 %vm3327_vm11, %v829_v41  ;;  %v3382_v45 = vadd.f32 %v1175_v35, %v1134_v2  ;;  %v1584_v6 = vld [vmem:[%s3604_s3 + $0x18] sm:$0xff] }
 0x2ed   : > { %v3384_v54 = vpop.f32.mrf.mxu0 }
 0x2ee   : > { %v1163_v41 = vpop.f32.mrf.mxu1 }
 0x2f3   : > { %1455 = vmatmul.f32.gmra.mxu2 %v803_v63  ;;  %v1137_v15 = vpop.f32.mrf.mxu2  ;;  %v1158_v63 = vadd.f32 %v1157_v25, %v3356_v29  ;;  %v1164_v25 = vadd.f32 %v1163_v41, %v3384_v54 }
 0x2f4   : > { %1496 = vmatmul.f32.gmra.mxu3 %v2987_v30  ;;  %1534 = vmatmul.f32.gmra.mxu0 %v828_v60  ;;  %v1178_v56 = vpop.f32.mrf.mxu3  ;;  %v1592_v30 = vld [vmem:[%s3604_s3 + $0x58] sm:$0xff] }
 0x2f5   : > { %v3401_v33 = vadd.f32 %v1178_v56, %v1137_v15  ;;  %1601 = vmatpush.msra.mxu1 %v1592_v30 }
 0x2f7   : > { %v3403_v38 = vpop.f32.mrf.mxu0  ;;  %1602 = vmatpush.msra.mxu1 %v1591_v3  ;;  %v1166_v42 = vpop.f32.mrf.mxu1 }
 0x2f9   : > { %1603 = vmatpush.msra.mxu1 %v1590_v28 }
 0x2fb   : > { %1604 = vmatpush.msra.mxu1 %v1589_v1 }
 0x2fc   : > { %1959 = vmatmul.msk.f32.gmra.mxu0 %vm2075_vm13, %v839_v34 }
 0x2fd   : > { %1605 = vmatpush.msra.mxu1 %v1588_v32 }
 0x2fe   : > { %v1198_v46 = vpop.f32.mrf.mxu2  ;;  %v1239_v24 = vpop.f32.mrf.mxu3 }
 0x2ff   : > { %1606 = vmatpush.msra.mxu1 %v1587_v61  ;;  %v1199_v60 = vadd.f32 %v1198_v46, %v1158_v63  ;;  %v3487_v46 = vld [vmem:[%s3607_s6] ss:$0 sm:$0xff]  ;;  %v1167_v63 = vadd.f32 %v1166_v42, %v3403_v38 }
 0x301   : > { %v1280_v4 = vpop.f32.mrf.mxu0  ;;  %1607 = vmatpush.msra.mxu1 %v1586_v62  ;;  %v1240_v26 = vadd.f32 %v1239_v24, %v1199_v60 }
 0x303   : > { %1608 = vmatpush.msra.mxu1 %v1585_v50  ;;  %v1281_v34 = vadd.f32 %v1280_v4, %v1240_v26 }
 0x305   : > { %1609 = vmatpush.msra.mxu1 %v1584_v6  ;;  %v1321_v12 = vpop.f32.mrf.mxu1 }
 0x306   : > { %v1201_v5 = vpop.f32.mrf.mxu2  ;;  %v1322_v32 = vadd.f32 %v1321_v12, %v1281_v34 }
 0x307   : > { %v1242_v57 = vpop.f32.mrf.mxu3  ;;  %1610 = vmatpush.msra.mxu1 %v1583_v39  ;;  %v1202_v37 = vadd.f32 %v1201_v5, %v1161_v49 }
 0x309   : > { %v1283_v27 = vpop.f32.mrf.mxu0  ;;  %1611 = vmatpush.msra.mxu1 %v1582_v58  ;;  %v1243_v61 = vadd.f32 %v1242_v57, %v1202_v37 }
 0x30b   : > { %1612 = vmatpush.msra.mxu1 %v1581_v11  ;;  %v1284_v5 = vadd.f32 %v1283_v27, %v1243_v61 }
 0x30d   : > { %v1324_v56 = vpop.f32.mrf.mxu1 }
 0x30e   : > { %v1204_v10 = vpop.f32.mrf.mxu2  ;;  %v1325_v11 = vadd.f32 %v1324_v56, %v1284_v5 }
 0x30f   : > { %v3427_v55 = vpop.f32.mrf.mxu3  ;;  %v1205_v62 = vadd.f32 %v1204_v10, %v1164_v25 }
 0x311   : > { %v3429_v48 = vpop.f32.mrf.mxu0  ;;  %v1246_v54 = vadd.f32 %v3427_v55, %v1205_v62 }
 0x313   : > { %v1287_v27 = vadd.f32 %v3429_v48, %v1246_v54 }
 0x315   : > { %v1327_v4 = vpop.f32.mrf.mxu1 }
 0x316   : > { %v3437_v59 = vpop.f32.mrf.mxu2  ;;  %v1328_v55 = vadd.f32 %v1327_v4, %v1287_v27 }
 0x317   : > { %v3439_v51 = vpop.f32.mrf.mxu3  ;;  %v1208_v10 = vadd.f32 %v3437_v59, %v1167_v63 }
 0x319   : > { %v3441_v0 = vpop.f32.mrf.mxu0 }
 0x31d   : > { %v1330_v34 = vpop.f32.mrf.mxu1 }
 0x31e   : > { %v3449_v13 = vpop.f32.mrf.mxu2 }
 0x31f   : > { %v3451_v31 = vpop.f32.mrf.mxu3  ;;  %v1211_v59 = vadd.f32 %v3449_v13, %v3361_v52 }
 0x321   : > { %v3456_v8 = vpop.f32.mrf.mxu0 }
 0x325   : > { %v1333_v5 = vpop.f32.mrf.mxu1 }
 0x326   : > { %v3458_v40 = vpop.f32.mrf.mxu2 }
 0x327   : > { %v3460_v53 = vpop.f32.mrf.mxu3  ;;  %v1214_v52 = vadd.f32 %v3458_v40, %v3368_v7 }
 0x329   : > { %v3465_v9 = vpop.f32.mrf.mxu0 }
 0x32e   : > { %v3470_v2 = vpop.f32.mrf.mxu2 }
 0x32f   : > { %v3472_v35 = vpop.f32.mrf.mxu3  ;;  %v1217_v7 = vadd.f32 %v3470_v2, %v3382_v45 }
 0x331   : > { %v3474_v47 = vpop.f32.mrf.mxu0 }
 0x336   : > { %v3477_v36 = vpop.f32.mrf.mxu2 }
 0x337   : > { %v3479_v14 = vpop.f32.mrf.mxu3  ;;  %v1220_v45 = vadd.f32 %v3477_v36, %v3401_v33 }
 0x339   : > { %v3481_v15 = vpop.f32.mrf.mxu0 }
 0x33e   : > { %v1435_v30 = vpop.f32.mrf.mxu2 }
 0x33f   : > { %v1476_v3 = vpop.f32.mrf.mxu3 }
 0x340   : > { %v1477_v28 = vadd.f32 %v1476_v3, %v1435_v30 }
 0x341   : > { %v1517_v1 = vpop.f32.mrf.mxu0 }
 0x342   : > { %v1518_v29 = vadd.f32 %v1517_v1, %v1477_v28  ;;  %v1249_v28 = vadd.f32 %v3439_v51, %v1208_v10  ;;  %v1252_v51 = vadd.f32 %v3451_v31, %v1211_v59  ;;  %v1255_v31 = vadd.f32 %v3460_v53, %v1214_v52 }
 0x343   : > { %v1258_v53 = vadd.f32 %v3472_v35, %v1217_v7  ;;  %v1261_v35 = vadd.f32 %v3479_v14, %v1220_v45 }
 0x344   : > { %v1541_v24 = vadd.f32 %v1518_v29, %v1322_v32  ;;  %v1290_v48 = vadd.f32 %v3441_v0, %v1249_v28  ;;  %v1293_v0 = vadd.f32 %v3456_v8, %v1252_v51  ;;  %v1296_v8 = vadd.f32 %v3465_v9, %v1255_v31 }
 0x345   : > { %v1299_v9 = vadd.f32 %v3474_v47, %v1258_v53  ;;  %v1302_v47 = vadd.f32 %v3481_v15, %v1261_v35 }
 0x346   : > { %v1553_v44 = vmul.f32 %v3487_v46, %v1541_v24  ;;  %v1438_v57 = vpop.f32.mrf.mxu2  ;;  %v1331_v62 = vadd.f32 %v1330_v34, %v1290_v48 }
 0x347   : > { %v1479_v50 = vpop.f32.mrf.mxu3 }
 0x348   : > { %v1565_v6 = vadd.f32 %v3493_v43, %v1553_v44  ;;  %v1480_v39 = vadd.f32 %v1479_v50, %v1438_v57 }
 0x349   : > { %v1520_v58 = vpop.f32.mrf.mxu0 }
 0x34a   : > { %v1573_v41 = vmax.f32 %v1565_v6, 0.0  ;;  %v1521_v12 = vadd.f32 %v1520_v58, %v1480_v39 }
 0x34c   : > { %v1542_v60 = vadd.f32 %v1521_v12, %v1325_v11  ;;  %1613 = vmatmul.f32.vlgmr.msra.gmra.mxu1 %v1573_v41  ;;  %v1334_v41 = vadd.f32 %v1333_v5, %v1293_v0 }
 0x34e   : > { %v1441_v26 = vpop.f32.mrf.mxu2  ;;  %v1554_v49 = vmul.f32 %v3487_v46, %v1542_v60  ;;  %v1336_v60 = vpop.f32.mrf.mxu1 }
 0x34f   : > { %v1482_v37 = vpop.f32.mrf.mxu3 }
 0x350   : > { %v1483_v30 = vadd.f32 %v1482_v37, %v1441_v26  ;;  %v1566_v56 = vadd.f32 %v3493_v43, %v1554_v49 }
 0x351   : > { %v1523_v3 = vpop.f32.mrf.mxu0 }
 0x352   : > { %v1524_v1 = vadd.f32 %v1523_v3, %v1483_v30  ;;  %v1574_v38 = vmax.f32 %v1566_v56, 0.0  ;;  %v1337_v30 = vadd.f32 %v1336_v60, %v1296_v8 }
 0x354   : > { %v1543_v42 = vadd.f32 %v1524_v1, %v1328_v55  ;;  %1616 = vmatmul.f32.gmra.mxu1 %v1574_v38 }
 0x356   : > { %v1444_v32 = vpop.f32.mrf.mxu2  ;;  %v1555_v61 = vmul.f32 %v3487_v46, %v1543_v42  ;;  %v1339_v28 = vpop.f32.mrf.mxu1 }
 0x357   : > { %v1485_v29 = vpop.f32.mrf.mxu3 }
 0x358   : > { %v1486_v25 = vadd.f32 %v1485_v29, %v1444_v32  ;;  %v1567_v24 = vadd.f32 %v3493_v43, %v1555_v61  ;;  %v1340_v32 = vadd.f32 %v1339_v28, %v1299_v9 }
 0x359   : > { %v1526_v4 = vpop.f32.mrf.mxu0 }
 0x35a   : > { %v1527_v44 = vadd.f32 %v1526_v4, %v1486_v25  ;;  %v1575_v57 = vmax.f32 %v1567_v24, 0.0 }
 0x35c   : > { %v1544_v50 = vadd.f32 %v1527_v44, %v1331_v62  ;;  %1619 = vmatmul.f32.gmra.mxu1 %v1575_v57 }
 0x35e   : > { %v1447_v13 = vpop.f32.mrf.mxu2  ;;  %v1556_v6 = vmul.f32 %v3487_v46, %v1544_v50  ;;  %v1342_v36 = vpop.f32.mrf.mxu1 }
 0x35f   : > { %v1488_v39 = vpop.f32.mrf.mxu3  ;;  %v1343_v44 = vadd.f32 %v1342_v36, %v1302_v47 }
 0x360   : > { %v1489_v58 = vadd.f32 %v1488_v39, %v1447_v13  ;;  %v1568_v11 = vadd.f32 %v3493_v43, %v1556_v6  ;;  %v2167_v13 = vld [vmem:[%s3609_s8] ss:$0 sm:$0xff] }
 0x361   : > { %v1529_v54 = vpop.f32.mrf.mxu0  ;;  %v2168_v6 = vld [vmem:[%s3610_s9] ss:$0 sm:$0xff] }
 0x362   : > { %v1530_v12 = vadd.f32 %v1529_v54, %v1489_v58  ;;  %v1576_v63 = vmax.f32 %v1568_v11, 0.0 }
 0x364   : > { %v1545_v27 = vadd.f32 %v1530_v12, %v1334_v41  ;;  %1622 = vmatmul.f32.gmra.mxu1 %v1576_v63 }
 0x366   : > { %v1450_v40 = vpop.f32.mrf.mxu2  ;;  %v1557_v10 = vmul.f32 %v3487_v46, %v1545_v27 }
 0x367   : > { %v1491_v26 = vpop.f32.mrf.mxu3 }
 0x368   : > { %v1492_v49 = vadd.f32 %v1491_v26, %v1450_v40  ;;  %v1569_v34 = vadd.f32 %v3493_v43, %v1557_v10 }
 0x369   : > { %v1532_v37 = vpop.f32.mrf.mxu0 }
 0x36a   : > { %v1533_v56 = vadd.f32 %v1532_v37, %v1492_v49  ;;  %v1577_v3 = vmax.f32 %v1569_v34, 0.0 }
 0x36c   : > { %v1546_v55 = vadd.f32 %v1533_v56, %v1337_v30  ;;  %1625 = vmatmul.f32.gmra.mxu1 %v1577_v3 }
 0x36e   : > { %v1453_v2 = vpop.f32.mrf.mxu2  ;;  %v1558_v1 = vmul.f32 %v3487_v46, %v1546_v55 }
 0x36f   : > { %v1494_v38 = vpop.f32.mrf.mxu3 }
 0x370   : > { %v1495_v42 = vadd.f32 %v1494_v38, %v1453_v2  ;;  %v1570_v48 = vadd.f32 %v3493_v43, %v1558_v1 }
 0x371   : > { %v1535_v59 = vpop.f32.mrf.mxu0 }
 0x372   : > { %v1536_v61 = vadd.f32 %v1535_v59, %v1495_v42  ;;  %v1578_v29 = vmax.f32 %v1570_v48, 0.0 }
 0x374   : > { %v1547_v25 = vadd.f32 %v1536_v61, %v1340_v32  ;;  %1628 = vmatmul.f32.gmra.mxu1 %v1578_v29 }
 0x376   : > { %v1456_v24 = vpop.f32.mrf.mxu2  ;;  %v1559_v33 = vmul.f32 %v3487_v46, %v1547_v25 }
 0x377   : > { %v1497_v5 = vpop.f32.mrf.mxu3 }
 0x378   : > { %v1498_v4 = vadd.f32 %v1497_v5, %v1456_v24  ;;  %v1571_v62 = vadd.f32 %v3493_v43, %v1559_v33 }
 0x379   : > { %v1538_v51 = vpop.f32.mrf.mxu0 }
 0x37a   : > { %v1539_v57 = vadd.f32 %v1538_v51, %v1498_v4  ;;  %v1579_v50 = vmax.f32 %v1571_v62, 0.0 }
 0x37c   : > { %v1548_v14 = vadd.f32 %v1539_v57, %v1343_v44  ;;  %1631 = vmatmul.f32.gmra.mxu1 %v1579_v50 }
 0x37e   : > { %v1560_v0 = vmul.f32 %v3487_v46, %v1548_v14 }
 0x380   : > { %v1572_v52 = vadd.f32 %v3493_v43, %v1560_v0 }
 0x382   : > { %v1580_v15 = vmax.f32 %v1572_v52, 0.0 }
 0x384   : > { %1634 = vmatmul.f32.gmra.mxu1 %v1580_v15 }
 0x3c9   : > { %v1614_v39 = vpop.f32.mrf.mxu1 }
 0x3ca   : > { %v1642_v58 = vmul.f32 %v2167_v13, %v1614_v39 }
 0x3cc   : > { %v1654_v11 = vadd.f32 %v2168_v6, %v1642_v58 }
 0x3ce   : > { %v1662_v54 = vadd.f32 %v1654_v11, %v2467_v18 }
 0x3d0   : > { %v1670_v46 = vmax.f32 %v1662_v54, 0.0 }
 0x3d1   : > { %v1617_v41 = vpop.f32.mrf.mxu1 }
 0x3d2   : > { %1678 = vst [vmem:[%s2499_s18] sm:$0xff] %v1670_v46  ;;  %v1643_v43 = vmul.f32 %v2167_v13, %v1617_v41 }
 0x3d4   : > { %v1655_v31 = vadd.f32 %v2168_v6, %v1643_v43 }
 0x3d6   : > { %v1663_v12 = vadd.f32 %v1655_v31, %v2483_v22 }
 0x3d8   : > { %v1671_v63 = vmax.f32 %v1663_v12, 0.0 }
 0x3d9   : > { %v1620_v60 = vpop.f32.mrf.mxu1 }
 0x3da   : > { %1679 = vst [vmem:[%s2499_s18 + $0x8] sm:$0xff] %v1671_v63  ;;  %v1644_v27 = vmul.f32 %v2167_v13, %v1620_v60 }
 0x3dc   : > { %v1656_v8 = vadd.f32 %v2168_v6, %v1644_v27 }
 0x3de   : > { %v1664_v7 = vadd.f32 %v1656_v8, %v2470_v19 }
 0x3e0   : > { %v1672_v40 = vmax.f32 %v1664_v7, 0.0 }
 0x3e1   : > { %v1623_v10 = vpop.f32.mrf.mxu1 }
 0x3e2   : > { %1680 = vst [vmem:[%s2499_s18 + $0x10] sm:$0xff] %v1672_v40  ;;  %v1645_v18 = vmul.f32 %v2167_v13, %v1623_v10 }
 0x3e4   : > { %v1657_v26 = vadd.f32 %v2168_v6, %v1645_v18 }
 0x3e6   : > { %v1665_v49 = vadd.f32 %v1657_v26, %v2486_v23 }
 0x3e8   : > { %v1673_v34 = vmax.f32 %v1665_v49, 0.0 }
 0x3e9   : > { %v1626_v22 = vpop.f32.mrf.mxu1 }
 0x3ea   : > { %1681 = vst [vmem:[%s2499_s18 + $0x18] sm:$0xff] %v1673_v34  ;;  %v1646_v37 = vmul.f32 %v2167_v13, %v1626_v22 }
 0x3ec   : > { %v1658_v30 = vadd.f32 %v2168_v6, %v1646_v37 }
 0x3ee   : > { %v1666_v53 = vadd.f32 %v1658_v30, %v2461_v16 }
 0x3f0   : > { %v1674_v56 = vmax.f32 %v1666_v53, 0.0 }
 0x3f1   : > { %v1629_v3 = vpop.f32.mrf.mxu1 }
 0x3f2   : > { %1682 = vst [vmem:[%s2499_s18 + $0x20] sm:$0xff] %v1674_v56  ;;  %v1647_v19 = vmul.f32 %v2167_v13, %v1629_v3 }
 0x3f4   : > { %v1659_v55 = vadd.f32 %v2168_v6, %v1647_v19 }
 0x3f6   : > { %v1667_v28 = vadd.f32 %v1659_v55, %v2477_v20 }
 0x3f8   : > { %v1675_v9 = vmax.f32 %v1667_v28, 0.0 }
 0x3f9   : > { %v1632_v23 = vpop.f32.mrf.mxu1 }
 0x3fa   : > { %1683 = vst [vmem:[%s2499_s18 + $0x28] sm:$0xff] %v1675_v9  ;;  %v1648_v45 = vmul.f32 %v2167_v13, %v1632_v23 }
 0x3fc   : > { %v1660_v2 = vadd.f32 %v2168_v6, %v1648_v45 }
 0x3fe   : > { %v1668_v16 = vadd.f32 %v1660_v2, %v2464_v17 }
 0x400   : > { %v1676_v1 = vmax.f32 %v1668_v16, 0.0 }
 0x401   : > { %v1635_v38 = vpop.f32.mrf.mxu1 }
 0x402   : > { %1684 = vst [vmem:[%s2499_s18 + $0x30] sm:$0xff] %v1676_v1  ;;  %v1649_v20 = vmul.f32 %v2167_v13, %v1635_v38 }
 0x404   : > { %v1661_v42 = vadd.f32 %v2168_v6, %v1649_v20 }
 0x406   : > { %v1669_v48 = vadd.f32 %v1661_v42, %v2480_v21 }
 0x408   : > { %v1677_v59 = vmax.f32 %v1669_v48, 0.0 }
 0x40a   : > { %1685 = vst [vmem:[%s2499_s18 + $0x38] sm:$0xff] %v1677_v59 }
 0x40b   : > { %2196 = shalt.err (!%p2193_p11)
}
 0x40c   : > { %s2267_s18 = smov 128   ;;  %s2268_s25 = smov 8  }
 0x40d   : > { %2076 = dma.vmem_to_hbm [thread:$0]  (%p2375_p3), %s1702_s16, 1024, %s1704_s17, %s1687_s11, %s2267_s18, %s2267_s18, %s2268_s25  }
 0x40e PF: > { %p2090_p12 = scmp.ge.s32.totalorder %s2263_s20, 2  ;;  %s1718_s22 = sand.u32 1, %s2235_s13  }
 0x40f   : > { %s1719_s30 = scalar_lea.sflag [#allocation5], %s1718_s22 }
 0x410   : > { %p2079_p13 = pnand %p2090_p12, %p2384_p8 }
 0x412   : > { %p2080_p0 = pneg %p2079_p13 }
 0x414   : > { %2230 = dma.done.wait (%p2080_p0), %s1719_s30, 1024  }
 0x415   : > { %2232 = vsyncadd (%p2080_p0), %s1719_s30, 4294966272  ;;  %s23_s20 = sadd.s32 1, %s2263_s20   ;;  %s3646_s0 = sld [smem:[#allocation7_spill]] }
 0x416   : > { %p20_p1 = scmp.ge.s32.totalorder %s23_s20, 10   ;;  %s3647_s15 = sld [smem:[#allocation12_spill]] }
 0x417   : > { %s3648_s16 = sld [smem:[#allocation8_spill]]  ;;  %s3652_s13 = smov %s2239_s14 }
 0x418   : > { %s3649_s17 = sld [smem:[#allocation9_spill]]  ;;  %22 = sbr.rel (!%p20_p1) target bundleno = 7 (0x7), region = 116 }
 0x419   : > { %s3650_s18 = sld [smem:[#allocation10_spill]] }
 0x41a   : > { %s3651_s19 = sld [smem:[#allocation11_spill]] }
 0x41b   : > { %s3653_s14 = smov %s3646_s0 }
 0x41d   :  { %1725 = vsyncpa [#allocation5], 1 }
 0x41e   :  { %1727 = vsyncpa [#allocation5 + $0x1], 1 }

</bundles_post_ra>
